<compile_context>
chip_gen: v5e
topology: v5e:2x2
jax: 0.10.0
libtpu: 0.0.40
codegen_flags: <defaults>
</compile_context>

<pallas_src>
import functools
import math

import jax
import jax.numpy as jnp
from jax.experimental import pallas as pl
from jax.experimental.pallas import tpu as pltpu

# Tile targets.  Kept small so the toy test geometry exercises multi-step grids
# (K-accumulation + parallel output tiles).  For production CT sizes raise these
# toward 512 (re-derive for the v7x 64 MiB VMEM budget: 2 inputs x 2 buffers +
# output + f32 accumulator must stay well under the scoped limit).
MM_TN = 128        # output-column tile of the projector / backprojector matmuls
MM_TK = 128        # contraction tile of the projector / backprojector matmuls
CONV_TP = 256      # pixel (lane) tile of the conv im2col matmul
_VMEM_LIMIT = 32 * 1024 * 1024


def _pick_tile(dim, target):
    """Largest multiple of 128 that divides `dim` and is <= target, else the full dim."""
    if dim <= target:
        return dim
    t = (target // 128) * 128
    while t >= 128:
        if dim % t == 0:
            return t
        t -= 128
    return dim


# ----------------------------------------------------------------------------
# Kernel 1: projector fused with residual:  out = proj - x @ A^T
# ----------------------------------------------------------------------------
def _proj_residual_kernel(x_ref, at_ref, p_ref, o_ref, acc_ref):
    @pl.when(pl.program_id(1) == 0)
    def _():
        acc_ref[...] = jnp.zeros_like(acc_ref)

    acc_ref[...] += jnp.dot(x_ref[...].astype(jnp.bfloat16), at_ref[...],
                            preferred_element_type=jnp.float32)

    @pl.when(pl.program_id(1) == pl.num_programs(1) - 1)
    def _():
        o_ref[...] = p_ref[...] - acc_ref[...]


def projector_residual(x_flat, proj_flat, a_t):
    N, npix = x_flat.shape
    nproj = a_t.shape[1]
    tn = _pick_tile(nproj, MM_TN)
    tk = _pick_tile(npix, MM_TK)
    grid = (nproj // tn, npix // tk)
    cost = pl.CostEstimate(flops=2 * N * nproj * npix, transcendentals=0,
                           bytes_accessed=int(4 * x_flat.size + 2 * a_t.size
                                              + 8 * N * nproj))
    return pl.pallas_call(
        _proj_residual_kernel,
        out_shape=jax.ShapeDtypeStruct((N, nproj), jnp.float32),
        grid_spec=pltpu.PrefetchScalarGridSpec(
            num_scalar_prefetch=0,
            grid=grid,
            in_specs=[
                pl.BlockSpec((N, tk), lambda j, k: (0, k)),   # x
                pl.BlockSpec((tk, tn), lambda j, k: (k, j)),  # A^T (bf16)
                pl.BlockSpec((N, tn), lambda j, k: (0, j)),   # proj
            ],
            out_specs=pl.BlockSpec((N, tn), lambda j, k: (0, j)),
            scratch_shapes=[pltpu.VMEM((N, tn), jnp.float32)],
        ),
        compiler_params=pltpu.CompilerParams(
            dimension_semantics=("parallel", "arbitrary"),
            vmem_limit_bytes=_VMEM_LIMIT),
        cost_estimate=cost,
    )(x_flat, a_t, proj_flat)


# ----------------------------------------------------------------------------
# Kernel 2: filtered backprojection fused with combine:
#   out = ReLU( fid_w * (diff @ A_filt) + x + tmp2 )
# ----------------------------------------------------------------------------
def _fbp_combine_kernel(w_ref, d_ref, af_ref, x_ref, t2_ref, o_ref, acc_ref):
    @pl.when(pl.program_id(1) == 0)
    def _():
        acc_ref[...] = jnp.zeros_like(acc_ref)

    acc_ref[...] += jnp.dot(d_ref[...].astype(jnp.bfloat16), af_ref[...],
                            preferred_element_type=jnp.float32)

    @pl.when(pl.program_id(1) == pl.num_programs(1) - 1)
    def _():
        o_ref[...] = jnp.maximum(
            w_ref[0, 0] * acc_ref[...] + x_ref[...] + t2_ref[...], 0.0)


def fbp_combine(diff, x_flat, tmp2_flat, fid_w, a_filt):
    N, nproj = diff.shape
    npix = a_filt.shape[1]
    tn = _pick_tile(npix, MM_TN)
    tk = _pick_tile(nproj, MM_TK)
    grid = (npix // tn, nproj // tk)
    w11 = jnp.reshape(jnp.asarray(fid_w, jnp.float32), (1, 1))
    cost = pl.CostEstimate(flops=2 * N * npix * nproj, transcendentals=0,
                           bytes_accessed=int(4 * diff.size + 2 * a_filt.size
                                              + 4 * (2 * x_flat.size + tmp2_flat.size)))
    return pl.pallas_call(
        _fbp_combine_kernel,
        out_shape=jax.ShapeDtypeStruct((N, npix), jnp.float32),
        grid_spec=pltpu.PrefetchScalarGridSpec(
            num_scalar_prefetch=0,
            grid=grid,
            in_specs=[
                pl.BlockSpec((1, 1), lambda j, k: (0, 0),
                             memory_space=pltpu.MemorySpace.SMEM),  # fidelity weight
                pl.BlockSpec((N, tk), lambda j, k: (0, k)),          # residual
                pl.BlockSpec((tk, tn), lambda j, k: (k, j)),         # A_filt (bf16)
                pl.BlockSpec((N, tn), lambda j, k: (0, j)),          # x
                pl.BlockSpec((N, tn), lambda j, k: (0, j)),          # block2 output
            ],
            out_specs=pl.BlockSpec((N, tn), lambda j, k: (0, j)),
            scratch_shapes=[pltpu.VMEM((N, tn), jnp.float32)],
        ),
        compiler_params=pltpu.CompilerParams(
            dimension_semantics=("parallel", "arbitrary"),
            vmem_limit_bytes=_VMEM_LIMIT),
        cost_estimate=cost,
    )(w11, diff, a_flat_or(a_filt), x_flat, tmp2_flat)


def a_flat_or(a):  # tiny helper kept for clarity of the call above
    return a


# ----------------------------------------------------------------------------
# Kernel 3: 5x5 conv as one lane-dense im2col matmul (bias + optional ReLU fused)
# ----------------------------------------------------------------------------
def _conv_mm_kernel(w_ref, x_ref, b_ref, o_ref, *, relu):
    acc = jnp.dot(w_ref[...], x_ref[...], preferred_element_type=jnp.float32)
    acc = acc + b_ref[...]
    if relu:
        acc = jnp.maximum(acc, 0.0)
    o_ref[...] = acc


def _im2col(x_nchw, KH, KW, padding):
    """(N,Cin,H,W) -> (KH*KW*Cin, N*Ho*Wo), PyTorch cross-correlation ordering."""
    N, Cin, H, W = x_nchw.shape
    Ho = H + 2 * padding - KH + 1
    Wo = W + 2 * padding - KW + 1
    xp = jnp.pad(x_nchw, ((0, 0), (0, 0), (padding, padding), (padding, padding)))
    taps = [xp[:, :, kh:kh + Ho, kw:kw + Wo] for kh in range(KH) for kw in range(KW)]
    # (KH*KW, N, Cin, Ho, Wo) -> (KH*KW, Cin, N, Ho, Wo) -> (KH*KW*Cin, N*Ho*Wo)
    return jnp.stack(taps, 0).transpose(0, 2, 1, 3, 4).reshape(KH * KW * Cin, N * Ho * Wo)


def conv2d(x_nchw, weight, bias, padding, relu):
    """PyTorch-semantics Conv2d: out(Cout, N*H*W) = W(Cout, K) @ X(K, N*H*W)."""
    N, Cin, H, W = x_nchw.shape
    Cout, _, KH, KW = weight.shape
    Ho = H + 2 * padding - KH + 1
    Wo = W + 2 * padding - KW + 1
    P = N * Ho * Wo
    K = KH * KW * Cin
    # TODO(synk): for production image sizes, generate the KH*KW windows inside the
    # kernel from one padded slab (VMEM scratch) instead of materializing KxP in HBM.
    x2d = _im2col(x_nchw, KH, KW, padding).astype(jnp.bfloat16)
    w2d = weight.transpose(0, 2, 3, 1).reshape(Cout, K).astype(jnp.bfloat16)
    b2d = bias.reshape(Cout, 1).astype(jnp.float32)

    tp = _pick_tile(P, CONV_TP)
    grid = (P // tp,)
    cost = pl.CostEstimate(flops=2 * Cout * K * P, transcendentals=0,
                           bytes_accessed=int(2 * (K * P + Cout * K)
                                              + 4 * (Cout + Cout * P)))
    out2d = pl.pallas_call(
        functools.partial(_conv_mm_kernel, relu=relu),
        out_shape=jax.ShapeDtypeStruct((Cout, P), jnp.float32),
        grid_spec=pltpu.PrefetchScalarGridSpec(
            num_scalar_prefetch=0,
            grid=grid,
            in_specs=[
                pl.BlockSpec((Cout, K), lambda j: (0, 0)),   # weights (bf16)
                pl.BlockSpec((K, tp), lambda j: (0, j)),     # im2col patches (bf16)
                pl.BlockSpec((Cout, 1), lambda j: (0, 0)),   # bias
            ],
            out_specs=pl.BlockSpec((Cout, tp), lambda j: (0, j)),
        ),
        compiler_params=pltpu.CompilerParams(
            dimension_semantics=("parallel",),
            vmem_limit_bytes=_VMEM_LIMIT),
        cost_estimate=cost,
    )(w2d, x2d, b2d)
    return out2d.reshape(Cout, N, Ho, Wo).transpose(1, 0, 2, 3)   # back to NCHW


# ----------------------------------------------------------------------------
# Constants (FBP ramp filter + cosine weights folded into the backprojector,
# synthetic system matrix; streamed constants stored in bf16)
# ----------------------------------------------------------------------------
def build_constants(options, H, W):
    views = int(options[0])
    dets = int(options[1])
    dImg = float(options[4])
    dDet = float(options[5])
    s2r = float(options[8])
    d2r = float(options[9])
    virdet = dDet * s2r / (s2r + d2r)
    pi = math.pi

    # ramp filter, identical to the PyTorch loop
    idx = jnp.arange(2 * dets - 1)
    xk = idx - dets + 1
    xf = xk.astype(jnp.float32)
    safe = jnp.where(xk == 0, 1.0, xf)
    filt = jnp.where(jnp.abs(xk) % 2 == 1,
                     -1.0 / (pi * pi * safe * safe * virdet * virdet), 0.0)
    filt = jnp.where(xk == 0, 1.0 / (4.0 * virdet * virdet), filt)

    # cosine detector weights (w in FBP.__init__)
    wdet = ((-dets / 2.0 + 0.5) + jnp.arange(dets, dtype=jnp.float32)) * virdet
    wdet = s2r / jnp.sqrt(s2r ** 2 + wdet ** 2) * virdet            # (dets,)

    # Toeplitz matrix of the "same" 1-D conv along detectors with the per-detector
    # weight folded in:  (p*w) conv filt  ==  p @ M_w
    ii = jnp.arange(dets)
    M = filt[ii[:, None] - ii[None, :] + dets - 1]
    M_w = (wdet[:, None] * M).astype(jnp.float32)
    coef = pi / views

    # deterministic synthetic (parallel-beam, linear footprint) system matrix A
    # TODO(synk): stands in for ctlib's fan-beam projector/backprojector.
    ang = jnp.arange(views, dtype=jnp.float32) * (pi / views)
    ys, xs = jnp.meshgrid(jnp.arange(H, dtype=jnp.float32),
                          jnp.arange(W, dtype=jnp.float32), indexing="ij")
    px = (xs - (W - 1) / 2.0) * dImg
    py = ((H - 1) / 2.0 - ys) * dImg
    t = (px.reshape(-1)[None, :] * jnp.cos(ang)[:, None]
         + py.reshape(-1)[None, :] * jnp.sin(ang)[:, None])          # (views, npix)
    det_pos = (jnp.arange(dets, dtype=jnp.float32) - (dets - 1) / 2.0) * virdet
    A = jnp.maximum(0.0, 1.0 - jnp.abs(t[:, None, :] - det_pos[None, :, None]) / virdet)
    A = (A * dImg).reshape(views * dets, H * W).astype(jnp.float32)  # (nproj, npix)

    # Fold cosine weights + ramp filter + pi/views into the backprojector:
    #   x_err = ((proj - x@A^T) @ blockdiag(M_w)) @ (A*coef) = (proj - x@A^T) @ A_filt
    A_bp = A * coef
    A_filt = jnp.einsum("de,vep->vdp", M_w,
                        A_bp.reshape(views, dets, H * W)).reshape(views * dets, H * W)

    return dict(
        A_T=A.T.astype(jnp.bfloat16),          # (npix, nproj)
        A_filt=A_filt.astype(jnp.bfloat16),    # (nproj, npix)
        views=views, dets=dets,
    )


# ----------------------------------------------------------------------------
# LEARN_FBP forward (Pallas) and a pure-jnp reference with identical numerics
# ----------------------------------------------------------------------------
def iter_block_forward(x_nchw, proj_flat, blk, consts, padding):
    N, _, H, W = x_nchw.shape
    npix = H * W
    x_flat = x_nchw.reshape(N, npix)

    # block2: conv(1->hid)+ReLU, conv(hid->hid)+ReLU, conv(hid->1)
    t = conv2d(x_nchw, blk["c1_w"], blk["c1_b"], padding, relu=True)
    t = conv2d(t, blk["c2_w"], blk["c2_b"], padding, relu=True)
    t = conv2d(t, blk["c3_w"], blk["c3_b"], padding, relu=False)
    tmp2_flat = t.reshape(N, npix)

    # block1 (fidelity): projector + residual fused; filtered backprojection with
    # the combine epilogue ReLU(w*x_err + x + tmp2) fused into the last K step.
    diff = projector_residual(x_flat, proj_flat, consts["A_T"])
    out = fbp_combine(diff, x_flat, tmp2_flat, blk["fid_w"], consts["A_filt"])
    return out.reshape(N, 1, H, W)


def learn_fbp_forward(x, proj, params, consts, padding):
    N = x.shape[0]
    proj_flat = proj.reshape(N, consts["views"] * consts["dets"]).astype(jnp.float32)
    for blk in params:
        x = iter_block_forward(x, proj_flat, blk, consts, padding)
    return x


def _conv2d_ref(x_nchw, weight, bias, padding, relu):
    N, Cin, H, W = x_nchw.shape
    Cout, _, KH, KW = weight.shape
    Ho = H + 2 * padding - KH + 1
    Wo = W + 2 * padding - KW + 1
    x2d = _im2col(x_nchw, KH, KW, padding).astype(jnp.bfloat16)
    w2d = weight.transpose(0, 2, 3, 1).reshape(Cout, KH * KW * Cin).astype(jnp.bfloat16)
    out = jnp.dot(w2d, x2d, preferred_element_type=jnp.float32) + bias.reshape(Cout, 1)
    if relu:
        out = jnp.maximum(out, 0.0)
    return out.reshape(Cout, N, Ho, Wo).transpose(1, 0, 2, 3)


def reference_forward(x, proj, params, consts, padding):
    N, _, H, W = x.shape
    npix = H * W
    proj_flat = proj.reshape(N, consts["views"] * consts["dets"]).astype(jnp.float32)
    for blk in params:
        x_flat = x.reshape(N, npix)
        t = _conv2d_ref(x, blk["c1_w"], blk["c1_b"], padding, True)
        t = _conv2d_ref(t, blk["c2_w"], blk["c2_b"], padding, True)
        t = _conv2d_ref(t, blk["c3_w"], blk["c3_b"], padding, False)
        tmp2 = t.reshape(N, npix)
        p_tmp = jnp.dot(x_flat.astype(jnp.bfloat16), consts["A_T"],
                        preferred_element_type=jnp.float32)
        diff = proj_flat - p_tmp
        x_err = jnp.dot(diff.astype(jnp.bfloat16), consts["A_filt"],
                        preferred_element_type=jnp.float32)
        x = jnp.maximum(blk["fid_w"] * x_err + x_flat + tmp2, 0.0).reshape(N, 1, H, W)
    return x


def init_params(key, block_num, hid, ks):
    params = []
    for _ in range(block_num):
        key, k1, k2, k3 = jax.random.split(key, 4)
        params.append(dict(
            c1_w=0.01 * jax.random.normal(k1, (hid, 1, ks, ks), jnp.float32),
            c1_b=jnp.zeros((hid,), jnp.float32),
            c2_w=0.01 * jax.random.normal(k2, (hid, hid, ks, ks), jnp.float32),
            c2_b=jnp.zeros((hid,), jnp.float32),
            c3_w=0.01 * jax.random.normal(k3, (1, hid, ks, ks), jnp.float32),
            c3_b=jnp.zeros((1,), jnp.float32),
            # PyTorch zero-inits this (module.weight.data.zero_()); a nonzero value is
            # used here so the fidelity path is numerically exercised by the test.
            fid_w=jnp.float32(0.05),
        ))
    return params


if __name__ == "__main__":
    key = jax.random.PRNGKey(0)

    # small geometry consistent with the module's options vector
    views, dets, H, W = 8, 16, 16, 16
    dImg = 0.125
    s2r, d2r = 5.0, 5.0
    dDet = 2.0 * dImg                       # => virdet == dImg
    options = jnp.array([views, dets, W, H, dImg, dDet, 0.0,
                         2.0 * math.pi / views, s2r, d2r, 0.0, 0.0], jnp.float32)
    consts = build_constants(options, H, W)

    block_num, hid_channels, kernel_size, padding = 2, 8, 5, 2
    key, kp, kx, kj = jax.random.split(key, 4)
    params = init_params(kp, block_num, hid_channels, kernel_size)

    input_data = jax.random.normal(kx, (2, 1, H, W), jnp.float32)
    proj = jax.random.normal(kj, (2, 1, views, dets), jnp.float32)

    fwd = jax.jit(functools.partial(learn_fbp_forward, consts=consts, padding=padding))
    out = jax.block_until_ready(fwd(input_data, proj, params))
    assert out.shape == (2, 1, H, W)
    assert bool(jnp.all(jnp.isfinite(out)))

    # cross-check against a pure-jnp reference using the same bf16 constants
    ref = jax.block_until_ready(reference_forward(input_data, proj, params, consts, padding))
    rel = float(jnp.max(jnp.abs(out - ref)) / (jnp.max(jnp.abs(ref)) + 1e-6))
    assert rel < 5e-2, f"mismatch vs jnp reference: rel={rel}"

    print("KERNEL_OK")
</pallas_src>

<mosaic_0001>
module attributes {stable_mosaic.version = 11 : i64} {
  func.func @_conv_mm_kernel(%arg0: i32, %arg1: memref<8x25xbf16, #tpu.memory_space<vmem>>, %arg2: memref<25x256xbf16, #tpu.memory_space<vmem>>, %arg3: memref<8x1xf32, #tpu.memory_space<vmem>>, %arg4: memref<8x256xf32, #tpu.memory_space<vmem>>) attributes {dimension_semantics = [#tpu.dimension_semantics<parallel>], iteration_bounds = array<i64: 2>, scalar_prefetch = 0 : i64, scratch_operands = 0 : i64, tpu.core_type = #tpu.core_type<tc>, window_params = [{pipeline_mode = #tpu.pipeline_mode<synchronous>, transform_indices = @transform_0, window_bounds = array<i64: 8, 25>}, {transform_indices = @transform_1, window_bounds = array<i64: 25, 256>}, {pipeline_mode = #tpu.pipeline_mode<synchronous>, transform_indices = @transform_2, window_bounds = array<i64: 8, 1>}, {transform_indices = @transform_3, window_bounds = array<i64: 8, 256>}]} {
    %c0 = arith.constant 0 : index
    %c0_0 = arith.constant 0 : index
    %0 = vector.load %arg1[%c0, %c0_0] : memref<8x25xbf16, #tpu.memory_space<vmem>>, vector<8x25xbf16>
    %c0_1 = arith.constant 0 : index
    %c0_2 = arith.constant 0 : index
    %1 = vector.load %arg2[%c0_1, %c0_2] : memref<25x256xbf16, #tpu.memory_space<vmem>>, vector<25x256xbf16>
    %cst = arith.constant dense<0.000000e+00> : vector<8x256xf32>
    %2 = tpu.matmul %0, %1, %cst {dimension_numbers = #tpu.dot_dimension_numbers<[1], [0], [0], [1], [0, 0, 1, 1], [], []>} : vector<8x25xbf16>, vector<25x256xbf16>, vector<8x256xf32> -> vector<8x256xf32>
    %c0_3 = arith.constant 0 : index
    %c0_4 = arith.constant 0 : index
    %3 = vector.load %arg3[%c0_3, %c0_4] : memref<8x1xf32, #tpu.memory_space<vmem>>, vector<8x1xf32>
    %4 = vector.broadcast %3 : vector<8x1xf32> to vector<8x256xf32>
    %5 = arith.addf %2, %4 : vector<8x256xf32>
    %cst_5 = arith.constant 0.000000e+00 : f32
    %6 = vector.broadcast %cst_5 : f32 to vector<8x256xf32>
    %7 = arith.maximumf %5, %6 : vector<8x256xf32>
    %c0_6 = arith.constant 0 : index
    %c0_7 = arith.constant 0 : index
    %8 = vector.load %arg4[%c0_6, %c0_7] : memref<8x256xf32, #tpu.memory_space<vmem>>, vector<8x256xf32>
    tpu.vector_store %arg4[%c0_6, %c0_7], %7 {strides = array<i32>} : memref<8x256xf32, #tpu.memory_space<vmem>>, vector<8x256xf32>,
    return
  }
  func.func @transform_0(%arg0: i32) -> (i32, i32) {
    %c0_i32 = arith.constant 0 : i32
    %c0_i32_0 = arith.constant 0 : i32
    %c0_i32_1 = arith.constant 0 : i32
    return %c0_i32, %c0_i32_0 : i32, i32
  }
  func.func @transform_1(%arg0: i32) -> (i32, i32) {
    %c0_i32 = arith.constant 0 : i32
    %c0_i32_0 = arith.constant 0 : i32
    return %c0_i32, %arg0 : i32, i32
  }
  func.func @transform_2(%arg0: i32) -> (i32, i32) {
    %c0_i32 = arith.constant 0 : i32
    %c0_i32_0 = arith.constant 0 : i32
    %c0_i32_1 = arith.constant 0 : i32
    return %c0_i32, %c0_i32_0 : i32, i32
  }
  func.func @transform_3(%arg0: i32) -> (i32, i32) {
    %c0_i32 = arith.constant 0 : i32
    %c0_i32_0 = arith.constant 0 : i32
    return %c0_i32, %arg0 : i32, i32
  }
}

module attributes {stable_mosaic.version = 11 : i64} {
  func.func @_conv_mm_kernel(%arg0: i32, %arg1: memref<8x200xbf16, #tpu.memory_space<vmem>>, %arg2: memref<200x256xbf16, #tpu.memory_space<vmem>>, %arg3: memref<8x1xf32, #tpu.memory_space<vmem>>, %arg4: memref<8x256xf32, #tpu.memory_space<vmem>>) attributes {dimension_semantics = [#tpu.dimension_semantics<parallel>], iteration_bounds = array<i64: 2>, scalar_prefetch = 0 : i64, scratch_operands = 0 : i64, tpu.core_type = #tpu.core_type<tc>, window_params = [{pipeline_mode = #tpu.pipeline_mode<synchronous>, transform_indices = @transform_0, window_bounds = array<i64: 8, 200>}, {transform_indices = @transform_1, window_bounds = array<i64: 200, 256>}, {pipeline_mode = #tpu.pipeline_mode<synchronous>, transform_indices = @transform_2, window_bounds = array<i64: 8, 1>}, {transform_indices = @transform_3, window_bounds = array<i64: 8, 256>}]} {
    %c0 = arith.constant 0 : index
    %c0_0 = arith.constant 0 : index
    %0 = vector.load %arg1[%c0, %c0_0] : memref<8x200xbf16, #tpu.memory_space<vmem>>, vector<8x200xbf16>
    %c0_1 = arith.constant 0 : index
    %c0_2 = arith.constant 0 : index
    %1 = vector.load %arg2[%c0_1, %c0_2] : memref<200x256xbf16, #tpu.memory_space<vmem>>, vector<200x256xbf16>
    %cst = arith.constant dense<0.000000e+00> : vector<8x256xf32>
    %2 = tpu.matmul %0, %1, %cst {dimension_numbers = #tpu.dot_dimension_numbers<[1], [0], [0], [1], [0, 0, 1, 1], [], []>} : vector<8x200xbf16>, vector<200x256xbf16>, vector<8x256xf32> -> vector<8x256xf32>
    %c0_3 = arith.constant 0 : index
    %c0_4 = arith.constant 0 : index
    %3 = vector.load %arg3[%c0_3, %c0_4] : memref<8x1xf32, #tpu.memory_space<vmem>>, vector<8x1xf32>
    %4 = vector.broadcast %3 : vector<8x1xf32> to vector<8x256xf32>
    %5 = arith.addf %2, %4 : vector<8x256xf32>
    %cst_5 = arith.constant 0.000000e+00 : f32
    %6 = vector.broadcast %cst_5 : f32 to vector<8x256xf32>
    %7 = arith.maximumf %5, %6 : vector<8x256xf32>
    %c0_6 = arith.constant 0 : index
    %c0_7 = arith.constant 0 : index
    %8 = vector.load %arg4[%c0_6, %c0_7] : memref<8x256xf32, #tpu.memory_space<vmem>>, vector<8x256xf32>
    tpu.vector_store %arg4[%c0_6, %c0_7], %7 {strides = array<i32>} : memref<8x256xf32, #tpu.memory_space<vmem>>, vector<8x256xf32>,
    return
  }
  func.func @transform_0(%arg0: i32) -> (i32, i32) {
    %c0_i32 = arith.constant 0 : i32
    %c0_i32_0 = arith.constant 0 : i32
    %c0_i32_1 = arith.constant 0 : i32
    return %c0_i32, %c0_i32_0 : i32, i32
  }
  func.func @transform_1(%arg0: i32) -> (i32, i32) {
    %c0_i32 = arith.constant 0 : i32
    %c0_i32_0 = arith.constant 0 : i32
    return %c0_i32, %arg0 : i32, i32
  }
  func.func @transform_2(%arg0: i32) -> (i32, i32) {
    %c0_i32 = arith.constant 0 : i32
    %c0_i32_0 = arith.constant 0 : i32
    %c0_i32_1 = arith.constant 0 : i32
    return %c0_i32, %c0_i32_0 : i32, i32
  }
  func.func @transform_3(%arg0: i32) -> (i32, i32) {
    %c0_i32 = arith.constant 0 : i32
    %c0_i32_0 = arith.constant 0 : i32
    return %c0_i32, %arg0 : i32, i32
  }
}

module attributes {stable_mosaic.version = 11 : i64} {
  func.func @_conv_mm_kernel(%arg0: i32, %arg1: memref<1x200xbf16, #tpu.memory_space<vmem>>, %arg2: memref<200x256xbf16, #tpu.memory_space<vmem>>, %arg3: memref<1x1xf32, #tpu.memory_space<vmem>>, %arg4: memref<1x256xf32, #tpu.memory_space<vmem>>) attributes {dimension_semantics = [#tpu.dimension_semantics<parallel>], iteration_bounds = array<i64: 2>, scalar_prefetch = 0 : i64, scratch_operands = 0 : i64, tpu.core_type = #tpu.core_type<tc>, window_params = [{pipeline_mode = #tpu.pipeline_mode<synchronous>, transform_indices = @transform_0, window_bounds = array<i64: 1, 200>}, {transform_indices = @transform_1, window_bounds = array<i64: 200, 256>}, {pipeline_mode = #tpu.pipeline_mode<synchronous>, transform_indices = @transform_2, window_bounds = array<i64: 1, 1>}, {transform_indices = @transform_3, window_bounds = array<i64: 1, 256>}]} {
    %c0 = arith.constant 0 : index
    %c0_0 = arith.constant 0 : index
    %0 = vector.load %arg1[%c0, %c0_0] : memref<1x200xbf16, #tpu.memory_space<vmem>>, vector<1x200xbf16>
    %c0_1 = arith.constant 0 : index
    %c0_2 = arith.constant 0 : index
    %1 = vector.load %arg2[%c0_1, %c0_2] : memref<200x256xbf16, #tpu.memory_space<vmem>>, vector<200x256xbf16>
    %cst = arith.constant dense<0.000000e+00> : vector<1x256xf32>
    %2 = tpu.matmul %0, %1, %cst {dimension_numbers = #tpu.dot_dimension_numbers<[1], [0], [0], [1], [0, 0, 1, 1], [], []>} : vector<1x200xbf16>, vector<200x256xbf16>, vector<1x256xf32> -> vector<1x256xf32>
    %c0_3 = arith.constant 0 : index
    %c0_4 = arith.constant 0 : index
    %3 = vector.load %arg3[%c0_3, %c0_4] : memref<1x1xf32, #tpu.memory_space<vmem>>, vector<1x1xf32>
    %4 = vector.broadcast %3 : vector<1x1xf32> to vector<1x256xf32>
    %5 = arith.addf %2, %4 : vector<1x256xf32>
    %c0_5 = arith.constant 0 : index
    %c0_6 = arith.constant 0 : index
    %6 = vector.load %arg4[%c0_5, %c0_6] : memref<1x256xf32, #tpu.memory_space<vmem>>, vector<1x256xf32>
    tpu.vector_store %arg4[%c0_5, %c0_6], %5 {strides = array<i32>} : memref<1x256xf32, #tpu.memory_space<vmem>>, vector<1x256xf32>,
    return
  }
  func.func @transform_0(%arg0: i32) -> (i32, i32) {
    %c0_i32 = arith.constant 0 : i32
    %c0_i32_0 = arith.constant 0 : i32
    %c0_i32_1 = arith.constant 0 : i32
    return %c0_i32, %c0_i32_0 : i32, i32
  }
  func.func @transform_1(%arg0: i32) -> (i32, i32) {
    %c0_i32 = arith.constant 0 : i32
    %c0_i32_0 = arith.constant 0 : i32
    return %c0_i32, %arg0 : i32, i32
  }
  func.func @transform_2(%arg0: i32) -> (i32, i32) {
    %c0_i32 = arith.constant 0 : i32
    %c0_i32_0 = arith.constant 0 : i32
    %c0_i32_1 = arith.constant 0 : i32
    return %c0_i32, %c0_i32_0 : i32, i32
  }
  func.func @transform_3(%arg0: i32) -> (i32, i32) {
    %c0_i32 = arith.constant 0 : i32
    %c0_i32_0 = arith.constant 0 : i32
    return %c0_i32, %arg0 : i32, i32
  }
}

module attributes {stable_mosaic.version = 11 : i64} {
  func.func @_proj_residual_kernel(%arg0: i32, %arg1: i32, %arg2: memref<2x128xf32, #tpu.memory_space<vmem>>, %arg3: memref<128x128xbf16, #tpu.memory_space<vmem>>, %arg4: memref<2x128xf32, #tpu.memory_space<vmem>>, %arg5: memref<2x128xf32, #tpu.memory_space<vmem>>, %arg6: memref<2x128xf32, #tpu.memory_space<vmem>>) attributes {dimension_semantics = [#tpu.dimension_semantics<parallel>, #tpu.dimension_semantics<arbitrary>], iteration_bounds = array<i64: 1, 2>, scalar_prefetch = 0 : i64, scratch_operands = 1 : i64, tpu.core_type = #tpu.core_type<tc>, window_params = [{transform_indices = @transform_0, window_bounds = array<i64: 2, 128>}, {transform_indices = @transform_1, window_bounds = array<i64: 128, 128>}, {transform_indices = @transform_2, window_bounds = array<i64: 2, 128>}, {transform_indices = @transform_3, window_bounds = array<i64: 2, 128>}]} {
    %c0_i32 = arith.constant 0 : i32
    %0 = arith.cmpi eq, %arg1, %c0_i32 : i32
    %1 = arith.extui %0 : i1 to i32
    %c0_i32_0 = arith.constant 0 : i32
    %2 = arith.cmpi ne, %1, %c0_i32_0 : i32
    scf.if %2 {
      %cst_9 = arith.constant 0.000000e+00 : f32
      %13 = vector.broadcast %cst_9 : f32 to vector<2x128xf32>
      %c0_10 = arith.constant 0 : index
      %c0_11 = arith.constant 0 : index
      %14 = vector.load %arg6[%c0_10, %c0_11] : memref<2x128xf32, #tpu.memory_space<vmem>>, vector<2x128xf32>
      tpu.vector_store %arg6[%c0_10, %c0_11], %13 {strides = array<i32>} : memref<2x128xf32, #tpu.memory_space<vmem>>, vector<2x128xf32>,
    } else {
    }
    %c0 = arith.constant 0 : index
    %c0_1 = arith.constant 0 : index
    %3 = vector.load %arg6[%c0, %c0_1] : memref<2x128xf32, #tpu.memory_space<vmem>>, vector<2x128xf32>
    %c0_2 = arith.constant 0 : index
    %c0_3 = arith.constant 0 : index
    %4 = vector.load %arg2[%c0_2, %c0_3] : memref<2x128xf32, #tpu.memory_space<vmem>>, vector<2x128xf32>
    %5 = arith.truncf %4 : vector<2x128xf32> to vector<2x128xbf16>
    %c0_4 = arith.constant 0 : index
    %c0_5 = arith.constant 0 : index
    %6 = vector.load %arg3[%c0_4, %c0_5] : memref<128x128xbf16, #tpu.memory_space<vmem>>, vector<128x128xbf16>
    %cst = arith.constant dense<0.000000e+00> : vector<2x128xf32>
    %7 = tpu.matmul %5, %6, %cst {dimension_numbers = #tpu.dot_dimension_numbers<[1], [0], [0], [1], [0, 0, 1, 1], [], []>} : vector<2x128xbf16>, vector<128x128xbf16>, vector<2x128xf32> -> vector<2x128xf32>
    %8 = arith.addf %3, %7 : vector<2x128xf32>
    %c0_6 = arith.constant 0 : index
    %c0_7 = arith.constant 0 : index
    %9 = vector.load %arg6[%c0_6, %c0_7] : memref<2x128xf32, #tpu.memory_space<vmem>>, vector<2x128xf32>
    tpu.vector_store %arg6[%c0_6, %c0_7], %8 {strides = array<i32>} : memref<2x128xf32, #tpu.memory_space<vmem>>, vector<2x128xf32>,
    %c1_i32 = arith.constant 1 : i32
    %10 = arith.cmpi eq, %arg1, %c1_i32 : i32
    %11 = arith.extui %10 : i1 to i32
    %c0_i32_8 = arith.constant 0 : i32
    %12 = arith.cmpi ne, %11, %c0_i32_8 : i32
    scf.if %12 {
      %c0_9 = arith.constant 0 : index
      %c0_10 = arith.constant 0 : index
      %13 = vector.load %arg4[%c0_9, %c0_10] : memref<2x128xf32, #tpu.memory_space<vmem>>, vector<2x128xf32>
      %c0_11 = arith.constant 0 : index
      %c0_12 = arith.constant 0 : index
      %14 = vector.load %arg6[%c0_11, %c0_12] : memref<2x128xf32, #tpu.memory_space<vmem>>, vector<2x128xf32>
      %15 = arith.subf %13, %14 : vector<2x128xf32>
      %c0_13 = arith.constant 0 : index
      %c0_14 = arith.constant 0 : index
      %16 = vector.load %arg5[%c0_13, %c0_14] : memref<2x128xf32, #tpu.memory_space<vmem>>, vector<2x128xf32>
      tpu.vector_store %arg5[%c0_13, %c0_14], %15 {strides = array<i32>} : memref<2x128xf32, #tpu.memory_space<vmem>>, vector<2x128xf32>,
    } else {
    }
    return
  }
  func.func @transform_0(%arg0: i32, %arg1: i32) -> (i32, i32) {
    %c0_i32 = arith.constant 0 : i32
    %c0_i32_0 = arith.constant 0 : i32
    return %c0_i32, %arg1 : i32, i32
  }
  func.func @transform_1(%arg0: i32, %arg1: i32) -> (i32, i32) {
    %c0_i32 = arith.constant 0 : i32
    return %arg1, %arg0 : i32, i32
  }
  func.func @transform_2(%arg0: i32, %arg1: i32) -> (i32, i32) {
    %c0_i32 = arith.constant 0 : i32
    %c0_i32_0 = arith.constant 0 : i32
    return %c0_i32, %arg0 : i32, i32
  }
  func.func @transform_3(%arg0: i32, %arg1: i32) -> (i32, i32) {
    %c0_i32 = arith.constant 0 : i32
    %c0_i32_0 = arith.constant 0 : i32
    return %c0_i32, %arg0 : i32, i32
  }
}

module attributes {stable_mosaic.version = 11 : i64} {
  func.func @_fbp_combine_kernel(%arg0: i32, %arg1: i32, %arg2: memref<1x1xf32, #tpu.memory_space<smem>>, %arg3: memref<2x128xf32, #tpu.memory_space<vmem>>, %arg4: memref<128x128xbf16, #tpu.memory_space<vmem>>, %arg5: memref<2x128xf32, #tpu.memory_space<vmem>>, %arg6: memref<2x128xf32, #tpu.memory_space<vmem>>, %arg7: memref<2x128xf32, #tpu.memory_space<vmem>>, %arg8: memref<2x128xf32, #tpu.memory_space<vmem>>) attributes {dimension_semantics = [#tpu.dimension_semantics<parallel>, #tpu.dimension_semantics<arbitrary>], iteration_bounds = array<i64: 2, 1>, scalar_prefetch = 0 : i64, scratch_operands = 1 : i64, tpu.core_type = #tpu.core_type<tc>, window_params = [{transform_indices = @transform_0, window_bounds = array<i64: 1, 1>}, {transform_indices = @transform_1, window_bounds = array<i64: 2, 128>}, {transform_indices = @transform_2, window_bounds = array<i64: 128, 128>}, {transform_indices = @transform_3, window_bounds = array<i64: 2, 128>}, {transform_indices = @transform_4, window_bounds = array<i64: 2, 128>}, {transform_indices = @transform_5, window_bounds = array<i64: 2, 128>}]} {
    %c0_i32 = arith.constant 0 : i32
    %0 = arith.cmpi eq, %arg1, %c0_i32 : i32
    %1 = arith.extui %0 : i1 to i32
    %c0_i32_0 = arith.constant 0 : i32
    %2 = arith.cmpi ne, %1, %c0_i32_0 : i32
    scf.if %2 {
      %cst_10 = arith.constant 0.000000e+00 : f32
      %13 = vector.broadcast %cst_10 : f32 to vector<2x128xf32>
      %c0_11 = arith.constant 0 : index
      %c0_12 = arith.constant 0 : index
      %14 = vector.load %arg8[%c0_11, %c0_12] : memref<2x128xf32, #tpu.memory_space<vmem>>, vector<2x128xf32>
      tpu.vector_store %arg8[%c0_11, %c0_12], %13 {strides = array<i32>} : memref<2x128xf32, #tpu.memory_space<vmem>>, vector<2x128xf32>,
    } else {
    }
    %c0 = arith.constant 0 : index
    %c0_1 = arith.constant 0 : index
    %3 = vector.load %arg8[%c0, %c0_1] : memref<2x128xf32, #tpu.memory_space<vmem>>, vector<2x128xf32>
    %c0_2 = arith.constant 0 : index
    %c0_3 = arith.constant 0 : index
    %4 = vector.load %arg3[%c0_2, %c0_3] : memref<2x128xf32, #tpu.memory_space<vmem>>, vector<2x128xf32>
    %5 = arith.truncf %4 : vector<2x128xf32> to vector<2x128xbf16>
    %c0_4 = arith.constant 0 : index
    %c0_5 = arith.constant 0 : index
    %6 = vector.load %arg4[%c0_4, %c0_5] : memref<128x128xbf16, #tpu.memory_space<vmem>>, vector<128x128xbf16>
    %cst = arith.constant dense<0.000000e+00> : vector<2x128xf32>
    %7 = tpu.matmul %5, %6, %cst {dimension_numbers = #tpu.dot_dimension_numbers<[1], [0], [0], [1], [0, 0, 1, 1], [], []>} : vector<2x128xbf16>, vector<128x128xbf16>, vector<2x128xf32> -> vector<2x128xf32>
    %8 = arith.addf %3, %7 : vector<2x128xf32>
    %c0_6 = arith.constant 0 : index
    %c0_7 = arith.constant 0 : index
    %9 = vector.load %arg8[%c0_6, %c0_7] : memref<2x128xf32, #tpu.memory_space<vmem>>, vector<2x128xf32>
    tpu.vector_store %arg8[%c0_6, %c0_7], %8 {strides = array<i32>} : memref<2x128xf32, #tpu.memory_space<vmem>>, vector<2x128xf32>,
    %c0_i32_8 = arith.constant 0 : i32
    %10 = arith.cmpi eq, %arg1, %c0_i32_8 : i32
    %11 = arith.extui %10 : i1 to i32
    %c0_i32_9 = arith.constant 0 : i32
    %12 = arith.cmpi ne, %11, %c0_i32_9 : i32
    scf.if %12 {
      %c0_10 = arith.constant 0 : index
      %c0_11 = arith.constant 0 : index
      %13 = memref.load %arg2[%c0_10, %c0_11] : memref<1x1xf32, #tpu.memory_space<smem>>
      %c0_12 = arith.constant 0 : index
      %c0_13 = arith.constant 0 : index
      %14 = vector.load %arg8[%c0_12, %c0_13] : memref<2x128xf32, #tpu.memory_space<vmem>>, vector<2x128xf32>
      %15 = vector.broadcast %13 : f32 to vector<2x128xf32>
      %16 = arith.mulf %15, %14 : vector<2x128xf32>
      %c0_14 = arith.constant 0 : index
      %c0_15 = arith.constant 0 : index
      %17 = vector.load %arg5[%c0_14, %c0_15] : memref<2x128xf32, #tpu.memory_space<vmem>>, vector<2x128xf32>
      %18 = arith.addf %16, %17 : vector<2x128xf32>
      %c0_16 = arith.constant 0 : index
      %c0_17 = arith.constant 0 : index
      %19 = vector.load %arg6[%c0_16, %c0_17] : memref<2x128xf32, #tpu.memory_space<vmem>>, vector<2x128xf32>
      %20 = arith.addf %18, %19 : vector<2x128xf32>
      %cst_18 = arith.constant 0.000000e+00 : f32
      %21 = vector.broadcast %cst_18 : f32 to vector<2x128xf32>
      %22 = arith.maximumf %20, %21 : vector<2x128xf32>
      %c0_19 = arith.constant 0 : index
      %c0_20 = arith.constant 0 : index
      %23 = vector.load %arg7[%c0_19, %c0_20] : memref<2x128xf32, #tpu.memory_space<vmem>>, vector<2x128xf32>
      tpu.vector_store %arg7[%c0_19, %c0_20], %22 {strides = array<i32>} : memref<2x128xf32, #tpu.memory_space<vmem>>, vector<2x128xf32>,
    } else {
    }
    return
  }
  func.func @transform_0(%arg0: i32, %arg1: i32) -> (i32, i32) {
    %c0_i32 = arith.constant 0 : i32
    %c0_i32_0 = arith.constant 0 : i32
    %c0_i32_1 = arith.constant 0 : i32
    return %c0_i32, %c0_i32_0 : i32, i32
  }
  func.func @transform_1(%arg0: i32, %arg1: i32) -> (i32, i32) {
    %c0_i32 = arith.constant 0 : i32
    %c0_i32_0 = arith.constant 0 : i32
    return %c0_i32, %arg1 : i32, i32
  }
  func.func @transform_2(%arg0: i32, %arg1: i32) -> (i32, i32) {
    %c0_i32 = arith.constant 0 : i32
    return %arg1, %arg0 : i32, i32
  }
  func.func @transform_3(%arg0: i32, %arg1: i32) -> (i32, i32) {
    %c0_i32 = arith.constant 0 : i32
    %c0_i32_0 = arith.constant 0 : i32
    return %c0_i32, %arg0 : i32, i32
  }
  func.func @transform_4(%arg0: i32, %arg1: i32) -> (i32, i32) {
    %c0_i32 = arith.constant 0 : i32
    %c0_i32_0 = arith.constant 0 : i32
    return %c0_i32, %arg0 : i32, i32
  }
  func.func @transform_5(%arg0: i32, %arg1: i32) -> (i32, i32) {
    %c0_i32 = arith.constant 0 : i32
    %c0_i32_0 = arith.constant 0 : i32
    return %c0_i32, %arg0 : i32, i32
  }
}

</mosaic_0001>

<bundles_post_ra>
// kernel: learn_fbp_forward.10
= control target key start
LH: loop header
LB: loop body
LE: loop exit
PB: predicated region body
PF: predicated region fallthrough
CT: control target
= control target key end

     0   :  { %s466_s12 = smov 0   ;;  %s468_s13 = smov 0   ;;  %s524_s0 = inlined_call_operand.vmem [shape: bf16[8,25], index: 0, kind: input, shape index: {}]   ;;  %s525_s1 = inlined_call_operand.vmem [shape: bf16[25,512], index: 1, kind: input, shape index: {}]   ;;  %s526_s2 = inlined_call_operand.vmem [shape: f32[8,1], index: 2, kind: input, shape index: {}]   ;;  %s527_s3 = inlined_call_operand.vmem [shape: f32[8,512], index: 3, kind: output, shape index: {}]  }
   0x1   :  { %s470_s14 = smov 0  }
   0x2 LB: > { %s357_s15 = sadd.s32 4294967295, %s442_s14   ;;  %s483_s16 = sadd.s32 1, %s442_s14   ;;  %s442_s14 = sphi %s470_s14, %s530_s14   ;;  %s438_s13 = sphi %s468_s13, %s529_s13   ;;  %s434_s12 = sphi %s466_s12, %s528_s12  }
   0x3   : > { %s38_s17 = ssub.s32 %s442_s14, %s483_s16  ;;  %s41_s18 = sadd.s32 1, %s438_s13 }
   0x4   : > { %p39_p0 = scmp.eq.s32.totalorder %s38_s17, 0  ;;  %p48_p1 = scmp.ne.s32.totalorder %s438_s13, %s434_s12 }
   0x5   : > { %p49_p2 = scmp.eq.s32.totalorder %s442_s14, 0  ;;  %p360_p4 = scmp.ge.s32.totalorder %s442_s14, 2 }
   0x6   : > { %s492_s19 = scalar_select %p39_p0, %s438_s13, %s41_s18  }
   0x7   : > { %p50_p3 = por %p49_p2, %p48_p1  ;;  %127 = sbr.rel (%p360_p4) target bundleno = 20 (0x14), region = 24 }
   0xc   : > { %130 = sbr.rel (!%p50_p3) target bundleno = 20 (0x14), region = 28  ;;  %s132_s20 = sand.u32 (%p50_p3), 1, %s438_s13  }
   0xd   : > { %s388_s21 = sshll.u32 (%p50_p3), %s442_s14, 3  ;;  %s361_s22 = sshll.u32 (%p50_p3), %s132_s20, 5 }
   0xe   : > { %s137_s25 = scalar_lea.vmem (%p50_p3), %s525_s1, %s388_s21  ;;  %s134_s26 = scalar_lea.vmem (%p50_p3), [#allocation2], %s361_s22 }
   0xf   : > { %v172_v0 = vld [vmem:[%s137_s25] sm:$0xff] (%p50_p3)  ;;  %v174_v1 = vld [vmem:[%s137_s25 + $0x10] sm:$0xff] (%p50_p3) }
  0x10   : > { %v176_v2 = vld [vmem:[%s137_s25 + $0x20] sm:$0xff] (%p50_p3)  ;;  %173 = vst [vmem:[%s134_s26] sm:$0xff] (%p50_p3), %v172_v0  ;;  %v178_v3 = vld [vmem:[%s137_s25 + $0x30] sm:$0xff] (%p50_p3) }
  0x11   : > { %175 = vst [vmem:[%s134_s26 + $0x8] sm:$0xff] %v174_v1 }
  0x12   : > { %177 = vst [vmem:[%s134_s26 + $0x10] sm:$0xff] %v176_v2 }
  0x13   : > { %179 = vst [vmem:[%s134_s26 + $0x18] sm:$0xff] %v178_v3 }
  0x14 PF: > { %p364_p5 = scmp.ge.s32.totalorder %s442_s14, 1  ;;  %p184_p6 = scmp.lt.s32.totalorder %s442_s14, 3 }
  0x16   : > { %p185_p7 = pnand %p364_p5, %p184_p6 }
  0x17   : > { %s191_s27 = sand.u32 (!%p185_p7), 1, %s434_s12   ;;  %s366_s7 = sshll.u32 (!%p185_p7), %s357_s15, 1 }
  0x18   : > { %188 = sbr.rel (%p185_p7) target bundleno = 177 (0xb1), region = 66  ;;  %s365_s28 = sshll.u32 (!%p185_p7), %s191_s27, 5 }
  0x19   : > { %s193_s4 = scalar_lea.vmem (!%p185_p7), [#allocation2], %s365_s28  ;;  %p216_p8 = scmp.lt.s32.totalorder (!%p185_p7), %s366_s7, 3 }
  0x1d   : > { %vm255_vm0 = vcmask 1043456   ;;  %vm256_vm1 = vcmask 1044480   ;;  %v444_v4 = vmov 65535   ;;  %v227_v6 = vld [vmem:[%s526_s2] sm:$0xff]  ;;  %v445_v8 = vmov 0   ;;  %s532_s7 = smov (!%p216_p8, %s366_s7), 3 }
  0x1e   : > { %v257_v5 = vsel %vm255_vm0, 4294967295, %v444_v4  ;;  %419 = vset.pattern.permute.xlu0 %v445_v8  ;;  %v378_v9 = vld [vmem:[%s193_s4 + $0x10] sm:$0xf]  ;;  %v392_v10 = vld [vmem:[%s193_s4 + $0x14] sm:$0x10]  ;;  %vm251_vm2 = vcmask 203776  }
  0x1f   : > { %v258_v7 = vsel %vm256_vm1, %v257_v5, 0  ;;  %v391_v11 = vld [vmem:[%s193_s4 + $0x14] sm:$0xf]  ;;  %230 = vperm.xlu0 %419, %v227_v6   ;;  %v379_v12 = vor.u32 %v392_v10, %v378_v9  ;;  %v380_v13 = vld [vmem:[%s193_s4 + $0x18] sm:$0x10]  ;;  %s367_s8 = sshll.u32 %s532_s7, 3 }
  0x20   : > { %v383_v14 = vor.u32 %v391_v11, %v380_v13  ;;  %v370_v15 = vld [vmem:[%s193_s4] sm:$0xf]  ;;  %v390_v16 = vld [vmem:[%s193_s4 + $0x4] sm:$0xf0]  ;;  %v389_v18 = vld [vmem:[%s193_s4 + $0x4] sm:$0xf]  ;;  %s219_s11 = scalar_lea.vmem %s527_s3, %s367_s8 }
  0x21   : > { %v260_v17 = vand.u32 %v379_v12, %v258_v7  ;;  %v372_v19 = vld [vmem:[%s193_s4 + $0x8] sm:$0xf0]  ;;  %v371_v21 = vor.u32 %v390_v16, %v370_v15  ;;  %v222_v23 = vld [vmem:[%s524_s0] sm:$0xf] }
  0x22   : > { %v263_v20 = vand.u32 %v383_v14, %v258_v7  ;;  %v375_v22 = vor.u32 %v389_v18, %v372_v19 }
  0x23   : > { %271 = vmatpush.bf16.msra.mxu0 %v260_v17 }
  0x24   : > { %284 = vmatpush.bf16.msra.mxu1 %v263_v20 }
  0x27   : > { %272 = vmatpush.bf16.msra.mxu0 %v371_v21 }
  0x28   : > { %285 = vmatpush.bf16.msra.mxu1 %v375_v22 }
  0x2a   : > { %384 = vmatmul.msk.bf16.vlgmr.msra.gmra.mxu0 %vm251_vm2, %v222_v23 }
  0x2b   : > { %385 = vmatmul.msk.bf16.vlgmr.msra.gmra.mxu1 %vm251_vm2, %v222_v23 }
  0x91   : > { %v231_v24 = vpop.permute.xlu0 %230 }
  0xa7   : > { %v274_v25 = vpop.f32.mrf.mxu0 }
  0xa8   : > { %v275_v26 = vadd.f32 %v274_v25, %v231_v24  ;;  %v287_v27 = vpop.f32.mrf.mxu1 }
  0xa9   : > { %v288_v28 = vadd.f32 %v287_v27, %v231_v24 }
  0xaa   : > { %v291_v29 = vmax.f32 %v275_v26, 0.0 }
  0xab   : > { %v292_v30 = vmax.f32 %v288_v28, 0.0 }
  0xac   : > { %293 = vst [vmem:[%s219_s11] sm:$0xff] %v291_v29 }
  0xad   : > { %294 = vst [vmem:[%s219_s11 + $0x8] sm:$0xff] %v292_v30 }
  0xaf   : > { %v276_v31 = vpop.f32.mrf.mxu0 }
  0xb0   : > { %v289_v32 = vpop.f32.mrf.mxu1 }
  0xb1 PF: > { %p10_p9 = scmp.ge.s32.totalorder %s483_s16, 4   ;;  %s528_s12 = smov %s438_s13 }
  0xb2   : > { %s529_s13 = smov %s492_s19  ;;  %s530_s14 = smov %s483_s16 }
  0xb3   :  { %12 = sbr.rel (!%p10_p9) target bundleno = 2 (0x2), region = 105 }

// kernel: learn_fbp_forward.11
= control target key start
LH: loop header
LB: loop body
LE: loop exit
PB: predicated region body
PF: predicated region fallthrough
CT: control target
= control target key end

     0   :  { %s805_s12 = smov 0   ;;  %s807_s13 = smov 0   ;;  %s968_s0 = inlined_call_operand.vmem [shape: bf16[8,200], index: 0, kind: input, shape index: {}]   ;;  %s969_s1 = inlined_call_operand.vmem [shape: bf16[200,512], index: 1, kind: input, shape index: {}]   ;;  %s970_s2 = inlined_call_operand.vmem [shape: f32[8,1], index: 2, kind: input, shape index: {}]   ;;  %s971_s3 = inlined_call_operand.vmem [shape: f32[8,512], index: 3, kind: output, shape index: {}]  }
   0x1   :  { %s809_s14 = smov 0  }
   0x2 LB: > { %s598_s15 = sadd.s32 4294967295, %s782_s14   ;;  %s822_s16 = sadd.s32 1, %s782_s14   ;;  %s782_s14 = sphi %s809_s14, %s974_s14   ;;  %s778_s13 = sphi %s807_s13, %s973_s13   ;;  %s774_s12 = sphi %s805_s12, %s972_s12  }
   0x3   : > { %s38_s17 = ssub.s32 %s782_s14, %s822_s16  ;;  %s41_s18 = sadd.s32 1, %s778_s13 }
   0x4   : > { %p39_p0 = scmp.eq.s32.totalorder %s38_s17, 0  ;;  %p48_p1 = scmp.ne.s32.totalorder %s778_s13, %s774_s12 }
   0x5   : > { %p49_p2 = scmp.eq.s32.totalorder %s782_s14, 0  ;;  %p601_p4 = scmp.ge.s32.totalorder %s782_s14, 2 }
   0x6   : > { %s831_s19 = scalar_select %p39_p0, %s778_s13, %s41_s18  }
   0x7   : > { %p50_p3 = por %p49_p2, %p48_p1  ;;  %127 = sbr.rel (%p601_p4) target bundleno = 41 (0x29), region = 24 }
   0xc   : > { %130 = sbr.rel (!%p50_p3) target bundleno = 41 (0x29), region = 28  ;;  %s132_s20 = sand.u32 (%p50_p3), 1, %s778_s13  }
   0xd   : > { %s707_s21 = sshll.u32 (%p50_p3), %s782_s14, 3  ;;  %s732_s22 = smul.u32 (%p50_p3), 200, %s132_s20 }
   0xe   : > { %s839_s25 = scalar_lea.vmem (%p50_p3), %s969_s1, %s707_s21 }
   0xf   : > { %v214_v0 = vld [vmem:[%s839_s25] sm:$0xff] (%p50_p3)  ;;  %v216_v1 = vld [vmem:[%s839_s25 + $0x10] sm:$0xff] (%p50_p3)  ;;  %s844_s26 = scalar_lea.vmem (%p50_p3), [#allocation2], %s732_s22 }
  0x10   : > { %v218_v2 = vld [vmem:[%s839_s25 + $0x20] sm:$0xff] (%p50_p3)  ;;  %215 = vst [vmem:[%s844_s26] sm:$0xff] (%p50_p3), %v214_v0  ;;  %v220_v3 = vld [vmem:[%s839_s25 + $0x30] sm:$0xff] (%p50_p3) }
  0x11   : > { %217 = vst [vmem:[%s844_s26 + $0x8] sm:$0xff] %v216_v1  ;;  %v222_v4 = vld [vmem:[%s839_s25 + $0x40] sm:$0xff]  ;;  %v224_v5 = vld [vmem:[%s839_s25 + $0x50] sm:$0xff] }
  0x12   : > { %219 = vst [vmem:[%s844_s26 + $0x10] sm:$0xff] %v218_v2  ;;  %v226_v6 = vld [vmem:[%s839_s25 + $0x60] sm:$0xff]  ;;  %v228_v7 = vld [vmem:[%s839_s25 + $0x70] sm:$0xff] }
  0x13   : > { %221 = vst [vmem:[%s844_s26 + $0x18] sm:$0xff] %v220_v3  ;;  %v230_v8 = vld [vmem:[%s839_s25 + $0x80] sm:$0xff]  ;;  %v232_v9 = vld [vmem:[%s839_s25 + $0x90] sm:$0xff] }
  0x14   : > { %223 = vst [vmem:[%s844_s26 + $0x20] sm:$0xff] %v222_v4  ;;  %v234_v10 = vld [vmem:[%s839_s25 + $0xa0] sm:$0xff]  ;;  %v236_v11 = vld [vmem:[%s839_s25 + $0xb0] sm:$0xff] }
  0x15   : > { %225 = vst [vmem:[%s844_s26 + $0x28] sm:$0xff] %v224_v5  ;;  %v238_v12 = vld [vmem:[%s839_s25 + $0xc0] sm:$0xff]  ;;  %v240_v13 = vld [vmem:[%s839_s25 + $0xd0] sm:$0xff] }
  0x16   : > { %227 = vst [vmem:[%s844_s26 + $0x30] sm:$0xff] %v226_v6  ;;  %v242_v14 = vld [vmem:[%s839_s25 + $0xe0] sm:$0xff]  ;;  %v244_v15 = vld [vmem:[%s839_s25 + $0xf0] sm:$0xff] }
  0x17   : > { %229 = vst [vmem:[%s844_s26 + $0x38] sm:$0xff] %v228_v7  ;;  %v246_v16 = vld [vmem:[%s839_s25 + $0x100] sm:$0xff]  ;;  %v248_v17 = vld [vmem:[%s839_s25 + $0x110] sm:$0xff] }
  0x18   : > { %231 = vst [vmem:[%s844_s26 + $0x40] sm:$0xff] %v230_v8  ;;  %v250_v18 = vld [vmem:[%s839_s25 + $0x120] sm:$0xff]  ;;  %v252_v19 = vld [vmem:[%s839_s25 + $0x130] sm:$0xff] }
  0x19   : > { %233 = vst [vmem:[%s844_s26 + $0x48] sm:$0xff] %v232_v9  ;;  %v254_v20 = vld [vmem:[%s839_s25 + $0x140] sm:$0xff]  ;;  %v256_v21 = vld [vmem:[%s839_s25 + $0x150] sm:$0xff] }
  0x1a   : > { %235 = vst [vmem:[%s844_s26 + $0x50] sm:$0xff] %v234_v10  ;;  %v258_v22 = vld [vmem:[%s839_s25 + $0x160] sm:$0xff]  ;;  %v260_v23 = vld [vmem:[%s839_s25 + $0x170] sm:$0xff] }
  0x1b   : > { %237 = vst [vmem:[%s844_s26 + $0x58] sm:$0xff] %v236_v11  ;;  %v262_v24 = vld [vmem:[%s839_s25 + $0x180] sm:$0xff] }
  0x1c   : > { %239 = vst [vmem:[%s844_s26 + $0x60] sm:$0xff] %v238_v12 }
  0x1d   : > { %241 = vst [vmem:[%s844_s26 + $0x68] sm:$0xff] %v240_v13 }
  0x1e   : > { %243 = vst [vmem:[%s844_s26 + $0x70] sm:$0xff] %v242_v14 }
  0x1f   : > { %245 = vst [vmem:[%s844_s26 + $0x78] sm:$0xff] %v244_v15 }
  0x20   : > { %247 = vst [vmem:[%s844_s26 + $0x80] sm:$0xff] %v246_v16 }
  0x21   : > { %249 = vst [vmem:[%s844_s26 + $0x88] sm:$0xff] %v248_v17 }
  0x22   : > { %251 = vst [vmem:[%s844_s26 + $0x90] sm:$0xff] %v250_v18 }
  0x23   : > { %253 = vst [vmem:[%s844_s26 + $0x98] sm:$0xff] %v252_v19 }
  0x24   : > { %255 = vst [vmem:[%s844_s26 + $0xa0] sm:$0xff] %v254_v20 }
  0x25   : > { %257 = vst [vmem:[%s844_s26 + $0xa8] sm:$0xff] %v256_v21 }
  0x26   : > { %259 = vst [vmem:[%s844_s26 + $0xb0] sm:$0xff] %v258_v22 }
  0x27   : > { %261 = vst [vmem:[%s844_s26 + $0xb8] sm:$0xff] %v260_v23 }
  0x28   : > { %263 = vst [vmem:[%s844_s26 + $0xc0] sm:$0xff] %v262_v24 }
  0x29 PF: > { %p604_p5 = scmp.ge.s32.totalorder %s782_s14, 1  ;;  %p268_p6 = scmp.lt.s32.totalorder %s782_s14, 3 }
  0x2b   : > { %p269_p7 = pnand %p604_p5, %p268_p6 }
  0x2c   : > { %s275_s27 = sand.u32 (!%p269_p7), 1, %s774_s12   ;;  %s605_s7 = sshll.u32 (!%p269_p7), %s598_s15, 1 }
  0x2d   : > { %272 = sbr.rel (%p269_p7) target bundleno = 225 (0xe1), region = 66  ;;  %p300_p8 = scmp.lt.s32.totalorder (!%p269_p7), %s605_s7, 3 }
  0x2e   : > { %s733_s28 = smul.u32 (!%p269_p7), 200, %s275_s27 }
  0x30   : > { %s896_s29 = scalar_lea.vmem (!%p269_p7), [#allocation2], %s733_s28 }
  0x32   : > { %v665_v25 = vld [vmem:[%s896_s29 + $0x70] sm:$0xf]  ;;  %v723_v26 = vld [vmem:[%s896_s29 + $0x74] sm:$0xf0]  ;;  %v722_v27 = vld [vmem:[%s896_s29 + $0x74] sm:$0xf] }
  0x33   : > { %v666_v28 = vor.u32 %v723_v26, %v665_v25  ;;  %v667_v29 = vld [vmem:[%s896_s29 + $0x78] sm:$0xf0]  ;;  %v657_v30 = vld [vmem:[%s896_s29 + $0x60] sm:$0xf]  ;;  %v721_v31 = vld [vmem:[%s896_s29 + $0x64] sm:$0xf0] }
  0x34   : > { %v670_v32 = vor.u32 %v722_v27, %v667_v29  ;;  %v720_v33 = vld [vmem:[%s896_s29 + $0x64] sm:$0xf]  ;;  %v659_v34 = vld [vmem:[%s896_s29 + $0x68] sm:$0xf0]  ;;  %v658_v36 = vor.u32 %v721_v31, %v657_v30  ;;  %vm473_vm0 = vcmask 1043456   ;;  %v784_v24 = vmov 0  }
  0x35   : > { %v331_v35 = vld [vmem:[%s896_s29 + $0xc0] sm:$0xff]  ;;  %480 = vmatpush.bf16.msra.mxu0 %v666_v28  ;;  %v662_v39 = vor.u32 %v720_v33, %v659_v34  ;;  %v649_v40 = vld [vmem:[%s896_s29 + $0x50] sm:$0xf]  ;;  %v719_v41 = vld [vmem:[%s896_s29 + $0x54] sm:$0xf0]  ;;  %759 = vset.pattern.permute.xlu0 %v784_v24  ;;  %vm469_vm1 = vcmask 588800  }
  0x36   : > { %v418_v37 = vunpack.c.h.b16 %v331_v35  ;;  %v417_v38 = vunpack.c.l.b16 %v331_v35  ;;  %506 = vmatpush.bf16.msra.mxu2 %v670_v32  ;;  %v718_v42 = vld [vmem:[%s896_s29 + $0x54] sm:$0xf]  ;;  %v651_v44 = vld [vmem:[%s896_s29 + $0x58] sm:$0xf0]  ;;  %v650_v49 = vor.u32 %v719_v41, %v649_v40  ;;  %v697_v51 = vld [vmem:[%s896_s29 + $0xb0] sm:$0xf] }
  0x37   : > { %v730_v45 = vld [vmem:[%s896_s29 + $0xb4] sm:$0xf]  ;;  %v699_v46 = vld [vmem:[%s896_s29 + $0xb8] sm:$0xf0]  ;;  %v731_v52 = vld [vmem:[%s896_s29 + $0xb4] sm:$0xf0]  ;;  %v654_v53 = vor.u32 %v718_v42, %v651_v44 }
  0x38   : > { %v444_v43 = vpack.c.b16 %v418_v37, %v418_v37  ;;  %v443_v47 = vpack.c.b16 %v417_v38, %v417_v38  ;;  %v702_v54 = vor.u32 %v730_v45, %v699_v46  ;;  %v641_v55 = vld [vmem:[%s896_s29 + $0x40] sm:$0xf]  ;;  %v717_v56 = vld [vmem:[%s896_s29 + $0x44] sm:$0xf0]  ;;  %v716_v57 = vld [vmem:[%s896_s29 + $0x44] sm:$0xf]  ;;  %v698_v61 = vor.u32 %v731_v52, %v697_v51 }
  0x39   : > { %481 = vmatpush.bf16.msra.mxu0 %v658_v36  ;;  %v643_v58 = vld [vmem:[%s896_s29 + $0x48] sm:$0xf0]  ;;  %v728_v59 = vld [vmem:[%s896_s29 + $0xa4] sm:$0xf]  ;;  %v689_v62 = vld [vmem:[%s896_s29 + $0xa0] sm:$0xf]  ;;  %v642_v0 = vor.u32 %v717_v56, %v641_v55 }
  0x3a   : > { %v478_v48 = vsel %vm473_vm0, %v444_v43, 0  ;;  %v475_v50 = vsel %vm473_vm0, %v443_v47, 0  ;;  %507 = vmatpush.bf16.msra.mxu2 %v662_v39  ;;  %v691_v60 = vld [vmem:[%s896_s29 + $0xa8] sm:$0xf0]  ;;  %v729_v63 = vld [vmem:[%s896_s29 + $0xa4] sm:$0xf0]  ;;  %v646_v1 = vor.u32 %v716_v57, %v643_v58 }
  0x3b   : > { %522 = vmatpush.bf16.msra.mxu3 %v478_v48  ;;  %496 = vmatpush.bf16.msra.mxu1 %v475_v50  ;;  %v694_v2 = vor.u32 %v728_v59, %v691_v60  ;;  %v633_v3 = vld [vmem:[%s896_s29 + $0x30] sm:$0xf]  ;;  %v715_v4 = vld [vmem:[%s896_s29 + $0x34] sm:$0xf0]  ;;  %v714_v5 = vld [vmem:[%s896_s29 + $0x34] sm:$0xf]  ;;  %v690_v9 = vor.u32 %v729_v63, %v689_v62 }
  0x3c   : > { %v635_v6 = vld [vmem:[%s896_s29 + $0x38] sm:$0xf0]  ;;  %v726_v7 = vld [vmem:[%s896_s29 + $0x94] sm:$0xf]  ;;  %v681_v10 = vld [vmem:[%s896_s29 + $0x90] sm:$0xf]  ;;  %v634_v12 = vor.u32 %v715_v4, %v633_v3 }
  0x3d   : > { %482 = vmatpush.bf16.msra.mxu0 %v650_v49  ;;  %v683_v8 = vld [vmem:[%s896_s29 + $0x98] sm:$0xf0]  ;;  %v727_v11 = vld [vmem:[%s896_s29 + $0x94] sm:$0xf0]  ;;  %v625_v13 = vld [vmem:[%s896_s29 + $0x20] sm:$0xf]  ;;  %v638_v15 = vor.u32 %v714_v5, %v635_v6 }
  0x3e   : > { %508 = vmatpush.bf16.msra.mxu2 %v654_v53  ;;  %v306_v14 = vld [vmem:[%s968_s0] sm:$0xff]  ;;  %v686_v16 = vor.u32 %v726_v7, %v683_v8  ;;  %v713_v17 = vld [vmem:[%s896_s29 + $0x24] sm:$0xf0]  ;;  %v627_v20 = vld [vmem:[%s896_s29 + $0x28] sm:$0xf0]  ;;  %v682_v23 = vor.u32 %v727_v11, %v681_v10  ;;  %s976_s7 = smov (!%p300_p8, %s605_s7), 3 }
  0x3f   : > { %523 = vmatpush.bf16.msra.mxu3 %v702_v54  ;;  %497 = vmatpush.bf16.msra.mxu1 %v698_v61  ;;  %v712_v18 = vld [vmem:[%s896_s29 + $0x24] sm:$0xf]  ;;  %v675_v22 = vld [vmem:[%s896_s29 + $0x88] sm:$0xf0]  ;;  %v673_v25 = vld [vmem:[%s896_s29 + $0x80] sm:$0xf]  ;;  %v626_v27 = vor.u32 %v713_v17, %v625_v13  ;;  %v340_v28 = vunpack.c.h.b16 %v306_v14  ;;  %v339_v43 = vunpack.c.l.b16 %v306_v14 }
  0x40   : > { %v332_v19 = vld [vmem:[%s970_s2] sm:$0xff]  ;;  %v725_v26 = vld [vmem:[%s896_s29 + $0x84] sm:$0xf0]  ;;  %v630_v29 = vor.u32 %v712_v18, %v627_v20  ;;  %v617_v31 = vld [vmem:[%s896_s29 + $0x10] sm:$0xf]  ;;  %s606_s8 = sshll.u32 %s976_s7, 3 }
  0x41   : > { %483 = vmatpush.bf16.msra.mxu0 %v642_v0  ;;  %v724_v21 = vld [vmem:[%s896_s29 + $0x84] sm:$0xf]  ;;  %335 = vperm.xlu0 %759, %v332_v19   ;;  %v711_v32 = vld [vmem:[%s896_s29 + $0x14] sm:$0xf0]  ;;  %v710_v33 = vld [vmem:[%s896_s29 + $0x14] sm:$0xf]  ;;  %v674_v35 = vor.u32 %v725_v26, %v673_v25  ;;  %v342_v36 = vpack.c.b16 %v340_v28, %v340_v28  ;;  %v341_v46 = vpack.c.b16 %v339_v43, %v339_v43  ;;  %s303_s11 = scalar_lea.vmem %s971_s3, %s606_s8 }
  0x42   : > { %509 = vmatpush.bf16.msra.mxu2 %v646_v1  ;;  %v678_v30 = vor.u32 %v724_v21, %v675_v22  ;;  %v619_v34 = vld [vmem:[%s896_s29 + $0x18] sm:$0xf0]  ;;  %v618_v37 = vor.u32 %v711_v32, %v617_v31  ;;  %v609_v39 = vld [vmem:[%s896_s29] sm:$0xf]  ;;  %v709_v40 = vld [vmem:[%s896_s29 + $0x4] sm:$0xf0] }
  0x43   : > { %524 = vmatpush.bf16.msra.mxu3 %v694_v2  ;;  %498 = vmatpush.bf16.msra.mxu1 %v690_v9  ;;  %v622_v38 = vor.u32 %v710_v33, %v619_v34  ;;  %v708_v41 = vld [vmem:[%s896_s29 + $0x4] sm:$0xf]  ;;  %v611_v42 = vld [vmem:[%s896_s29 + $0x8] sm:$0xf0]  ;;  %v610_v44 = vor.u32 %v709_v40, %v609_v39 }
  0x44   : > { %v614_v45 = vor.u32 %v708_v41, %v611_v42 }
  0x45   : > { %484 = vmatpush.bf16.msra.mxu0 %v634_v12 }
  0x46   : > { %510 = vmatpush.bf16.msra.mxu2 %v638_v15 }
  0x47   : > { %525 = vmatpush.bf16.msra.mxu3 %v686_v16  ;;  %499 = vmatpush.bf16.msra.mxu1 %v682_v23 }
  0x49   : > { %485 = vmatpush.bf16.msra.mxu0 %v626_v27 }
  0x4a   : > { %511 = vmatpush.bf16.msra.mxu2 %v630_v29 }
  0x4b   : > { %526 = vmatpush.bf16.msra.mxu3 %v678_v30  ;;  %500 = vmatpush.bf16.msra.mxu1 %v674_v35 }
  0x4d   : > { %486 = vmatpush.bf16.msra.mxu0 %v618_v37 }
  0x4e   : > { %704 = vmatmul.msk.bf16.vlgmr.msra.gmra.mxu3 %vm469_vm1, %v342_v36  ;;  %512 = vmatpush.bf16.msra.mxu2 %v622_v38 }
  0x4f   : > { %703 = vmatmul.msk.bf16.vlgmr.msra.gmra.mxu1 %vm469_vm1, %v342_v36 }
  0x51   : > { %487 = vmatpush.bf16.msra.mxu0 %v610_v44 }
  0x52   : > { %513 = vmatpush.bf16.msra.mxu2 %v614_v45 }
  0x54   : > { %488 = vmatmul.bf16.vlgmr.msra.gmra.mxu0 %v341_v46 }
  0x55   : > { %514 = vmatmul.bf16.vlgmr.msra.gmra.mxu2 %v341_v46 }
  0xb3   : > { %v336_v48 = vpop.permute.xlu0 %335 }
  0xcc   : > { %v502_v47 = vpop.f32.mrf.mxu1 }
  0xd1   : > { %v528_v49 = vpop.f32.mrf.mxu3  ;;  %v489_v50 = vpop.f32.mrf.mxu0 }
  0xd2   : > { %v490_v51 = vadd.f32 %v489_v50, %v336_v48 }
  0xd4   : > { %v504_v52 = vpop.f32.mrf.mxu1  ;;  %v503_v53 = vadd.f32 %v502_v47, %v490_v51 }
  0xd6   : > { %v532_v54 = vmax.f32 %v503_v53, 0.0 }
  0xd8   : > { %534 = vst [vmem:[%s303_s11] sm:$0xff] %v532_v54  ;;  %v515_v55 = vpop.f32.mrf.mxu2 }
  0xd9   : > { %v530_v56 = vpop.f32.mrf.mxu3  ;;  %v516_v57 = vadd.f32 %v515_v55, %v336_v48  ;;  %v491_v58 = vpop.f32.mrf.mxu0 }
  0xdb   : > { %v529_v59 = vadd.f32 %v528_v49, %v516_v57 }
  0xdd   : > { %v533_v60 = vmax.f32 %v529_v59, 0.0 }
  0xdf   : > { %535 = vst [vmem:[%s303_s11 + $0x8] sm:$0xff] %v533_v60 }
  0xe0   : > { %v517_v61 = vpop.f32.mrf.mxu2 }
  0xe1 PF: > { %p10_p9 = scmp.ge.s32.totalorder %s822_s16, 4   ;;  %s972_s12 = smov %s778_s13 }
  0xe2   : > { %s973_s13 = smov %s831_s19  ;;  %s974_s14 = smov %s822_s16 }
  0xe3   :  { %12 = sbr.rel (!%p10_p9) target bundleno = 2 (0x2), region = 105 }

// kernel: learn_fbp_forward.12
= control target key start
LH: loop header
LB: loop body
LE: loop exit
PB: predicated region body
PF: predicated region fallthrough
CT: control target
= control target key end

     0   :  { %s967_s0 = inlined_call_operand.vmem [shape: bf16[1,200], index: 0, kind: input, shape index: {}]   ;;  %s968_s1 = inlined_call_operand.vmem [shape: bf16[200,512], index: 1, kind: input, shape index: {}]   ;;  %s969_s2 = inlined_call_operand.<no memory space> [shape: f32[1,1], index: 2, kind: input, shape index: {}]   ;;  %s970_s3 = inlined_call_operand.vmem [shape: f32[1,512], index: 3, kind: output, shape index: {}]  }
   0x1   :  { %v8_v0 = vstv %s969_s2 }
   0x2   :  { %9 = vst [vmem:[#allocation2] sm:$0x1] %v8_v0 }
   0x3   :  { %s807_s14 = smov 0   ;;  %s809_s15 = smov 0  }
   0x4   :  { %s811_s16 = smov 0  }
   0x5 LB: > { %s598_s2 = sadd.s32 4294967295, %s781_s16   ;;  %s824_s17 = sadd.s32 1, %s781_s16   ;;  %s781_s16 = sphi %s811_s16, %s973_s16   ;;  %s777_s15 = sphi %s809_s15, %s972_s15   ;;  %s773_s14 = sphi %s807_s14, %s971_s14  }
   0x6   : > { %s40_s18 = ssub.s32 %s781_s16, %s824_s17  ;;  %s43_s19 = sadd.s32 1, %s777_s15 }
   0x7   : > { %p41_p0 = scmp.eq.s32.totalorder %s40_s18, 0  ;;  %p50_p1 = scmp.ne.s32.totalorder %s777_s15, %s773_s14 }
   0x8   : > { %p51_p2 = scmp.eq.s32.totalorder %s781_s16, 0  ;;  %p601_p4 = scmp.ge.s32.totalorder %s781_s16, 2 }
   0x9   : > { %s833_s20 = scalar_select %p41_p0, %s777_s15, %s43_s19  }
   0xa   : > { %p52_p3 = por %p51_p2, %p50_p1  ;;  %129 = sbr.rel (%p601_p4) target bundleno = 44 (0x2c), region = 24 }
   0xf   : > { %132 = sbr.rel (!%p52_p3) target bundleno = 44 (0x2c), region = 28  ;;  %s134_s21 = sand.u32 (%p52_p3), 1, %s777_s15  }
  0x10   : > { %s706_s22 = sshll.u32 (%p52_p3), %s781_s16, 3  ;;  %s731_s23 = smul.u32 (%p52_p3), 200, %s134_s21 }
  0x11   : > { %s841_s26 = scalar_lea.vmem (%p52_p3), %s968_s1, %s706_s22 }
  0x12   : > { %v216_v1 = vld [vmem:[%s841_s26] sm:$0xff] (%p52_p3)  ;;  %v218_v2 = vld [vmem:[%s841_s26 + $0x10] sm:$0xff] (%p52_p3)  ;;  %s846_s27 = scalar_lea.vmem (%p52_p3), [#allocation3], %s731_s23 }
  0x13   : > { %v220_v3 = vld [vmem:[%s841_s26 + $0x20] sm:$0xff] (%p52_p3)  ;;  %217 = vst [vmem:[%s846_s27] sm:$0xff] (%p52_p3), %v216_v1  ;;  %v222_v4 = vld [vmem:[%s841_s26 + $0x30] sm:$0xff] (%p52_p3) }
  0x14   : > { %219 = vst [vmem:[%s846_s27 + $0x8] sm:$0xff] %v218_v2  ;;  %v224_v5 = vld [vmem:[%s841_s26 + $0x40] sm:$0xff]  ;;  %v226_v6 = vld [vmem:[%s841_s26 + $0x50] sm:$0xff] }
  0x15   : > { %221 = vst [vmem:[%s846_s27 + $0x10] sm:$0xff] %v220_v3  ;;  %v228_v7 = vld [vmem:[%s841_s26 + $0x60] sm:$0xff]  ;;  %v230_v8 = vld [vmem:[%s841_s26 + $0x70] sm:$0xff] }
  0x16   : > { %223 = vst [vmem:[%s846_s27 + $0x18] sm:$0xff] %v222_v4  ;;  %v232_v9 = vld [vmem:[%s841_s26 + $0x80] sm:$0xff]  ;;  %v234_v10 = vld [vmem:[%s841_s26 + $0x90] sm:$0xff] }
  0x17   : > { %225 = vst [vmem:[%s846_s27 + $0x20] sm:$0xff] %v224_v5  ;;  %v236_v11 = vld [vmem:[%s841_s26 + $0xa0] sm:$0xff]  ;;  %v238_v12 = vld [vmem:[%s841_s26 + $0xb0] sm:$0xff] }
  0x18   : > { %227 = vst [vmem:[%s846_s27 + $0x28] sm:$0xff] %v226_v6  ;;  %v240_v13 = vld [vmem:[%s841_s26 + $0xc0] sm:$0xff]  ;;  %v242_v14 = vld [vmem:[%s841_s26 + $0xd0] sm:$0xff] }
  0x19   : > { %229 = vst [vmem:[%s846_s27 + $0x30] sm:$0xff] %v228_v7  ;;  %v244_v15 = vld [vmem:[%s841_s26 + $0xe0] sm:$0xff]  ;;  %v246_v16 = vld [vmem:[%s841_s26 + $0xf0] sm:$0xff] }
  0x1a   : > { %231 = vst [vmem:[%s846_s27 + $0x38] sm:$0xff] %v230_v8  ;;  %v248_v17 = vld [vmem:[%s841_s26 + $0x100] sm:$0xff]  ;;  %v250_v18 = vld [vmem:[%s841_s26 + $0x110] sm:$0xff] }
  0x1b   : > { %233 = vst [vmem:[%s846_s27 + $0x40] sm:$0xff] %v232_v9  ;;  %v252_v19 = vld [vmem:[%s841_s26 + $0x120] sm:$0xff]  ;;  %v254_v20 = vld [vmem:[%s841_s26 + $0x130] sm:$0xff] }
  0x1c   : > { %235 = vst [vmem:[%s846_s27 + $0x48] sm:$0xff] %v234_v10  ;;  %v256_v21 = vld [vmem:[%s841_s26 + $0x140] sm:$0xff]  ;;  %v258_v22 = vld [vmem:[%s841_s26 + $0x150] sm:$0xff] }
  0x1d   : > { %237 = vst [vmem:[%s846_s27 + $0x50] sm:$0xff] %v236_v11  ;;  %v260_v23 = vld [vmem:[%s841_s26 + $0x160] sm:$0xff]  ;;  %v262_v24 = vld [vmem:[%s841_s26 + $0x170] sm:$0xff] }
  0x1e   : > { %239 = vst [vmem:[%s846_s27 + $0x58] sm:$0xff] %v238_v12  ;;  %v264_v25 = vld [vmem:[%s841_s26 + $0x180] sm:$0xff] }
  0x1f   : > { %241 = vst [vmem:[%s846_s27 + $0x60] sm:$0xff] %v240_v13 }
  0x20   : > { %243 = vst [vmem:[%s846_s27 + $0x68] sm:$0xff] %v242_v14 }
  0x21   : > { %245 = vst [vmem:[%s846_s27 + $0x70] sm:$0xff] %v244_v15 }
  0x22   : > { %247 = vst [vmem:[%s846_s27 + $0x78] sm:$0xff] %v246_v16 }
  0x23   : > { %249 = vst [vmem:[%s846_s27 + $0x80] sm:$0xff] %v248_v17 }
  0x24   : > { %251 = vst [vmem:[%s846_s27 + $0x88] sm:$0xff] %v250_v18 }
  0x25   : > { %253 = vst [vmem:[%s846_s27 + $0x90] sm:$0xff] %v252_v19 }
  0x26   : > { %255 = vst [vmem:[%s846_s27 + $0x98] sm:$0xff] %v254_v20 }
  0x27   : > { %257 = vst [vmem:[%s846_s27 + $0xa0] sm:$0xff] %v256_v21 }
  0x28   : > { %259 = vst [vmem:[%s846_s27 + $0xa8] sm:$0xff] %v258_v22 }
  0x29   : > { %261 = vst [vmem:[%s846_s27 + $0xb0] sm:$0xff] %v260_v23 }
  0x2a   : > { %263 = vst [vmem:[%s846_s27 + $0xb8] sm:$0xff] %v262_v24 }
  0x2b   : > { %265 = vst [vmem:[%s846_s27 + $0xc0] sm:$0xff] %v264_v25 }
  0x2c PF: > { %p604_p5 = scmp.ge.s32.totalorder %s781_s16, 1  ;;  %p270_p6 = scmp.lt.s32.totalorder %s781_s16, 3 }
  0x2e   : > { %p271_p7 = pnand %p604_p5, %p270_p6 }
  0x2f   : > { %s277_s28 = sand.u32 (!%p271_p7), 1, %s773_s14   ;;  %s605_s6 = sshll.u32 (!%p271_p7), %s598_s2, 1 }
  0x30   : > { %274 = sbr.rel (%p271_p7) target bundleno = 229 (0xe5), region = 66  ;;  %p301_p8 = scmp.lt.s32.totalorder (!%p271_p7), %s605_s6, 3 }
  0x31   : > { %s732_s4 = smul.u32 (!%p271_p7), 200, %s277_s28 }
  0x33   : > { %s901_s5 = scalar_lea.vmem (!%p271_p7), [#allocation3], %s732_s4 }
  0x35   : > { %v306_v26 = vld [vmem:[%s967_s0] sm:$0x3]  ;;  %v666_v31 = vld [vmem:[%s901_s5 + $0x78] sm:$0xf0]  ;;  %v656_v32 = vld [vmem:[%s901_s5 + $0x60] sm:$0xf] }
  0x36   : > { %340 = vst [vmem:[#allocation1] ss:$9 sm:$0xff] %v306_v26  ;;  %v664_v27 = vld [vmem:[%s901_s5 + $0x70] sm:$0xf]  ;;  %v722_v28 = vld [vmem:[%s901_s5 + $0x74] sm:$0xf0] }
  0x37   : > { %v721_v29 = vld [vmem:[%s901_s5 + $0x74] sm:$0xf]  ;;  %v665_v30 = vor.u32 %v722_v28, %v664_v27  ;;  %v720_v33 = vld [vmem:[%s901_s5 + $0x64] sm:$0xf0]  ;;  %v719_v35 = vld [vmem:[%s901_s5 + $0x64] sm:$0xf] }
  0x38   : > { %v669_v34 = vor.u32 %v721_v29, %v666_v31  ;;  %v658_v36 = vld [vmem:[%s901_s5 + $0x68] sm:$0xf0]  ;;  %v331_v37 = vld [vmem:[%s901_s5 + $0xc0] sm:$0xff]  ;;  %v657_v38 = vor.u32 %v720_v33, %v656_v32  ;;  %vm472_vm0 = vcmask 1043456   ;;  %v648_v42 = vld [vmem:[%s901_s5 + $0x50] sm:$0xf] }
  0x39   : > { %479 = vmatpush.bf16.msra.mxu0 %v665_v30  ;;  %v418_v39 = vunpack.c.h.b16 %v331_v37  ;;  %v417_v40 = vunpack.c.l.b16 %v331_v37  ;;  %v661_v41 = vor.u32 %v719_v35, %v658_v36  ;;  %v718_v43 = vld [vmem:[%s901_s5 + $0x54] sm:$0xf0]  ;;  %v717_v44 = vld [vmem:[%s901_s5 + $0x54] sm:$0xf]  ;;  %v650_v46 = vld [vmem:[%s901_s5 + $0x58] sm:$0xf0] }
  0x3a   : > { %505 = vmatpush.bf16.msra.mxu2 %v669_v34  ;;  %v729_v47 = vld [vmem:[%s901_s5 + $0xb4] sm:$0xf]  ;;  %v698_v48 = vld [vmem:[%s901_s5 + $0xb8] sm:$0xf0]  ;;  %v649_v51 = vor.u32 %v718_v43, %v648_v42  ;;  %v696_v53 = vld [vmem:[%s901_s5 + $0xb0] sm:$0xf]  ;;  %v653_v55 = vor.u32 %v717_v44, %v650_v46 }
  0x3b   : > { %v444_v45 = vpack.c.b16 %v418_v39, %v418_v39  ;;  %v443_v49 = vpack.c.b16 %v417_v40, %v417_v40  ;;  %v730_v54 = vld [vmem:[%s901_s5 + $0xb4] sm:$0xf0]  ;;  %v701_v56 = vor.u32 %v729_v47, %v698_v48  ;;  %v640_v57 = vld [vmem:[%s901_s5 + $0x40] sm:$0xf]  ;;  %v716_v58 = vld [vmem:[%s901_s5 + $0x44] sm:$0xf0] }
  0x3c   : > { %v715_v59 = vld [vmem:[%s901_s5 + $0x44] sm:$0xf]  ;;  %v642_v60 = vld [vmem:[%s901_s5 + $0x48] sm:$0xf0]  ;;  %v697_v63 = vor.u32 %v730_v54, %v696_v53  ;;  %v688_v0 = vld [vmem:[%s901_s5 + $0xa0] sm:$0xf]  ;;  %v641_v2 = vor.u32 %v716_v58, %v640_v57 }
  0x3d   : > { %480 = vmatpush.bf16.msra.mxu0 %v657_v38  ;;  %v477_v50 = vsel %vm472_vm0, %v444_v45, 0  ;;  %v474_v52 = vsel %vm472_vm0, %v443_v49, 0  ;;  %v727_v61 = vld [vmem:[%s901_s5 + $0xa4] sm:$0xf]  ;;  %v690_v62 = vld [vmem:[%s901_s5 + $0xa8] sm:$0xf0]  ;;  %v645_v4 = vor.u32 %v715_v59, %v642_v60 }
  0x3e   : > { %506 = vmatpush.bf16.msra.mxu2 %v661_v41  ;;  %521 = vmatpush.bf16.msra.mxu3 %v477_v50  ;;  %v728_v1 = vld [vmem:[%s901_s5 + $0xa4] sm:$0xf0]  ;;  %v632_v3 = vld [vmem:[%s901_s5 + $0x30] sm:$0xf]  ;;  %v693_v5 = vor.u32 %v727_v61, %v690_v62  ;;  %v714_v6 = vld [vmem:[%s901_s5 + $0x34] sm:$0xf0] }
  0x3f   : > { %495 = vmatpush.bf16.msra.mxu1 %v474_v52  ;;  %v713_v7 = vld [vmem:[%s901_s5 + $0x34] sm:$0xf]  ;;  %v634_v8 = vld [vmem:[%s901_s5 + $0x38] sm:$0xf0]  ;;  %v689_v11 = vor.u32 %v728_v1, %v688_v0  ;;  %v680_v12 = vld [vmem:[%s901_s5 + $0x90] sm:$0xf]  ;;  %v633_v15 = vor.u32 %v714_v6, %v632_v3 }
  0x40   : > { %v725_v9 = vld [vmem:[%s901_s5 + $0x94] sm:$0xf]  ;;  %v682_v10 = vld [vmem:[%s901_s5 + $0x98] sm:$0xf0]  ;;  %v726_v13 = vld [vmem:[%s901_s5 + $0x94] sm:$0xf0]  ;;  %v637_v17 = vor.u32 %v713_v7, %v634_v8 }
  0x41   : > { %481 = vmatpush.bf16.msra.mxu0 %v649_v51  ;;  %v783_v14 = vmov 0   ;;  %v624_v16 = vld [vmem:[%s901_s5 + $0x20] sm:$0xf]  ;;  %v685_v18 = vor.u32 %v725_v9, %v682_v10  ;;  %v712_v19 = vld [vmem:[%s901_s5 + $0x24] sm:$0xf0]  ;;  %v681_v24 = vor.u32 %v726_v13, %v680_v12  ;;  %vm469_vm1 = vcmask 588800  }
  0x42   : > { %507 = vmatpush.bf16.msra.mxu2 %v653_v55  ;;  %522 = vmatpush.bf16.msra.mxu3 %v701_v56  ;;  %v711_v20 = vld [vmem:[%s901_s5 + $0x24] sm:$0xf]  ;;  %v626_v21 = vld [vmem:[%s901_s5 + $0x28] sm:$0xf0]  ;;  %v332_v25 = vld [vmem:[#allocation2] sm:$0x1]  ;;  %v625_v28 = vor.u32 %v712_v19, %v624_v16  ;;  %v537_v56 = vlaneseq }
  0x43   : > { %496 = vmatpush.bf16.msra.mxu1 %v697_v63  ;;  %758 = vset.pattern.permute.xlu0 %v783_v14  ;;  %v723_v22 = vld [vmem:[%s901_s5 + $0x84] sm:$0xf]  ;;  %v674_v23 = vld [vmem:[%s901_s5 + $0x88] sm:$0xf0]  ;;  %v672_v26 = vld [vmem:[%s901_s5 + $0x80] sm:$0xf]  ;;  %v629_v29 = vor.u32 %v711_v20, %v626_v21 }
  0x44   : > { %v724_v27 = vld [vmem:[%s901_s5 + $0x84] sm:$0xf0]  ;;  %335 = vperm.xlu0 %758, %v332_v25   ;;  %v677_v30 = vor.u32 %v723_v22, %v674_v23  ;;  %v616_v31 = vld [vmem:[%s901_s5 + $0x10] sm:$0xf]  ;;  %v710_v32 = vld [vmem:[%s901_s5 + $0x14] sm:$0xf0] }
  0x45   : > { %482 = vmatpush.bf16.msra.mxu0 %v641_v2  ;;  %v709_v33 = vld [vmem:[%s901_s5 + $0x14] sm:$0xf]  ;;  %v618_v34 = vld [vmem:[%s901_s5 + $0x18] sm:$0xf0]  ;;  %v673_v35 = vor.u32 %v724_v27, %v672_v26  ;;  %v617_v36 = vor.u32 %v710_v32, %v616_v31  ;;  %v608_v39 = vld [vmem:[%s901_s5] sm:$0xf] }
  0x46   : > { %508 = vmatpush.bf16.msra.mxu2 %v645_v4  ;;  %523 = vmatpush.bf16.msra.mxu3 %v693_v5  ;;  %v342_v37 = vld [vmem:[#allocation1 + $0x9] sm:$0xff]  ;;  %v621_v38 = vor.u32 %v709_v33, %v618_v34  ;;  %v708_v40 = vld [vmem:[%s901_s5 + $0x4] sm:$0xf0]  ;;  %v610_v42 = vld [vmem:[%s901_s5 + $0x8] sm:$0xf0]  ;;  %s975_s6 = smov (!%p301_p8, %s605_s6), 3 }
  0x47   : > { %497 = vmatpush.bf16.msra.mxu1 %v689_v11  ;;  %v707_v41 = vld [vmem:[%s901_s5 + $0x4] sm:$0xf]  ;;  %v609_v43 = vor.u32 %v708_v40, %v608_v39  ;;  %v341_v45 = vld [vmem:[#allocation1] sm:$0xff]  ;;  %vm534_vm2 = vcmask 1040384   ;;  %s303_s9 = scalar_lea.vmem %s970_s3, %s975_s6  ;;  %vm539_vm3 = vcmp.lt.s32.totalorder %v537_v56, 256 }
  0x48   : > { %v613_v44 = vor.u32 %v707_v41, %v610_v42 }
  0x49   : > { %483 = vmatpush.bf16.msra.mxu0 %v633_v15 }
  0x4a   : > { %509 = vmatpush.bf16.msra.mxu2 %v637_v17  ;;  %524 = vmatpush.bf16.msra.mxu3 %v685_v18 }
  0x4b   : > { %498 = vmatpush.bf16.msra.mxu1 %v681_v24 }
  0x4d   : > { %484 = vmatpush.bf16.msra.mxu0 %v625_v28 }
  0x4e   : > { %510 = vmatpush.bf16.msra.mxu2 %v629_v29  ;;  %525 = vmatpush.bf16.msra.mxu3 %v677_v30 }
  0x4f   : > { %499 = vmatpush.bf16.msra.mxu1 %v673_v35 }
  0x51   : > { %703 = vmatmul.msk.bf16.vlgmr.msra.gmra.mxu3 %vm469_vm1, %v342_v37  ;;  %485 = vmatpush.bf16.msra.mxu0 %v617_v36 }
  0x52   : > { %511 = vmatpush.bf16.msra.mxu2 %v621_v38  ;;  %702 = vmatmul.msk.bf16.vlgmr.msra.gmra.mxu1 %vm469_vm1, %v342_v37 }
  0x55   : > { %486 = vmatpush.bf16.msra.mxu0 %v609_v43 }
  0x56   : > { %512 = vmatpush.bf16.msra.mxu2 %v613_v44 }
  0x58   : > { %487 = vmatmul.bf16.vlgmr.msra.gmra.mxu0 %v341_v45 }
  0x59   : > { %513 = vmatmul.bf16.vlgmr.msra.gmra.mxu2 %v341_v45 }
  0xb6   : > { %v336_v49 = vpop.permute.xlu0 %335 }
  0xb7   : > { %v338_v51 = vperm.slane %v336_v49, 0 }
  0xcf   : > { %v501_v46 = vpop.f32.mrf.mxu1 }
  0xd4   : > { %v527_v47 = vpop.f32.mrf.mxu3 }
  0xd5   : > { %v488_v48 = vpop.f32.mrf.mxu0 }
  0xd6   : > { %v489_v54 = vadd.f32 %v488_v48, %v338_v51 }
  0xd7   : > { %v503_v50 = vpop.f32.mrf.mxu1 }
  0xd8   : > { %v502_v59 = vadd.f32 %v501_v46, %v489_v54 }
  0xdc   : > { %v514_v52 = vpop.f32.mrf.mxu2  ;;  %v529_v53 = vpop.f32.mrf.mxu3 }
  0xdd   : > { %v515_v55 = vadd.f32 %v514_v52, %v338_v51  ;;  %v490_v57 = vpop.f32.mrf.mxu0 }
  0xdf   : > { %v528_v58 = vadd.f32 %v527_v47, %v515_v55 }
  0xe1   : > { %v533_v60 = vrot.slane %v528_v58, 7 }
  0xe3   : > { %v535_v61 = vsel %vm534_vm2, %v502_v59, %v533_v60 }
  0xe4   : > { %541 = vst.msk [vmem:[%s303_s9] sm:$0x3] %vm539_vm3, %v535_v61  ;;  %v516_v62 = vpop.f32.mrf.mxu2 }
  0xe5 PF: > { %p12_p9 = scmp.ge.s32.totalorder %s824_s17, 4   ;;  %s971_s14 = smov %s777_s15 }
  0xe6   : > { %s972_s15 = smov %s833_s20  ;;  %s973_s16 = smov %s824_s17 }
  0xe7   :  { %14 = sbr.rel (!%p12_p9) target bundleno = 5 (0x5), region = 105 }

// kernel: learn_fbp_forward.14
= control target key start
LH: loop header
LB: loop body
LE: loop exit
PB: predicated region body
PF: predicated region fallthrough
CT: control target
= control target key end

     0   :  { %s867_s0 = inlined_call_operand.<no memory space> [shape: f32[1,1], index: 0, kind: input, shape index: {}]   ;;  %s868_s1 = inlined_call_operand.vmem [shape: f32[2,128], index: 1, kind: input, shape index: {}]   ;;  %s869_s2 = inlined_call_operand.vmem [shape: bf16[128,256], index: 2, kind: input, shape index: {}]   ;;  %s870_s3 = inlined_call_operand.vmem [shape: f32[2,256], index: 3, kind: input, shape index: {}]   ;;  %s871_s4 = inlined_call_operand.vmem [shape: f32[2,256], index: 4, kind: input, shape index: {}]   ;;  %s872_s5 = inlined_call_operand.vmem [shape: f32[2,256], index: 5, kind: output, shape index: {}]  }
   0x1   :  { %10 = sst [smem:[#allocation3]] %s867_s0 }
   0x2   :  { %s774_s20 = smov 0   ;;  %s776_s21 = smov 0  }
   0x3   :  { %s778_s22 = smov 0   ;;  %s780_s23 = smov 0  }
   0x4   :  { %s782_s24 = smov 0  }
   0x5 LB: > { %s28_s0 = sadd.s32 1, %s734_s23  ;;  %p91_p1 = scmp.ne.s32.totalorder %s726_s21, %s722_s20  ;;  %s738_s24 = sphi %s782_s24, %s16_s24   ;;  %s734_s23 = sphi %s780_s23, %s876_s23   ;;  %s730_s22 = sphi %s778_s22, %s875_s22   ;;  %s726_s21 = sphi %s776_s21, %s874_s21   ;;  %s722_s20 = sphi %s774_s20, %s873_s20  }
   0x6   : > { %p30_p0 = scmp.ge.s32.totalorder %s28_s0, 2  ;;  %p92_p2 = scmp.eq.s32.totalorder %s738_s24, 0 }
   0x7   : > { %s84_s26 = sadd.s32 1, %s726_s21  ;;  %p609_p5 = scmp.ge.s32.totalorder %s738_s24, 2 }
   0x8   : > { %s878_s0 = smov (%p30_p0, %s28_s0), 0  ;;  %p93_p3 = por %p92_p2, %p91_p1 }
   0x9   : > { %s80_s25 = ssub.s32 %s734_s23, %s878_s0  ;;  %205 = sbr.rel (%p609_p5) target bundleno = 34 (0x22), region = 24 }
   0xa   : > { %p82_p4 = scmp.eq.s32.totalorder %s80_s25, 0 }
   0xc   : > { %s809_s27 = scalar_select %p82_p4, %s726_s21, %s84_s26  }
   0xe   : > { %208 = sbr.rel (!%p93_p3) target bundleno = 34 (0x22), region = 28  ;;  %s210_s28 = sand.u32 (%p93_p3), 1, %s726_s21  }
   0xf   : > { %s611_s29 = sshll.u32 (%p93_p3), %s734_s23, 2  ;;  %s610_s30 = sshll.u32 (%p93_p3), %s210_s28, 6 }
  0x10   : > { %s817_s8 = scalar_lea.vmem (%p93_p3), %s869_s2, %s611_s29  ;;  %s212_s9 = scalar_lea.vmem (%p93_p3), [#allocation4], %s610_s30 }
  0x11   : > { %v234_v0 = vld [vmem:[%s817_s8] sm:$0xf] (%p93_p3)  ;;  %v236_v1 = vld [vmem:[%s817_s8 + $0x8] sm:$0xf] (%p93_p3)  ;;  %v238_v2 = vld [vmem:[%s817_s8 + $0x10] sm:$0xf] (%p93_p3) }
  0x12   : > { %235 = vst [vmem:[%s212_s9] sm:$0xf] (%p93_p3), %v234_v0  ;;  %v240_v3 = vld [vmem:[%s817_s8 + $0x18] sm:$0xf] (%p93_p3)  ;;  %v242_v4 = vld [vmem:[%s817_s8 + $0x20] sm:$0xf] (%p93_p3) }
  0x13   : > { %237 = vst [vmem:[%s212_s9 + $0x4] sm:$0xf] %v236_v1  ;;  %v244_v5 = vld [vmem:[%s817_s8 + $0x28] sm:$0xf]  ;;  %v246_v6 = vld [vmem:[%s817_s8 + $0x30] sm:$0xf] }
  0x14   : > { %239 = vst [vmem:[%s212_s9 + $0x8] sm:$0xf] %v238_v2  ;;  %v248_v7 = vld [vmem:[%s817_s8 + $0x38] sm:$0xf]  ;;  %v250_v8 = vld [vmem:[%s817_s8 + $0x40] sm:$0xf] }
  0x15   : > { %241 = vst [vmem:[%s212_s9 + $0xc] sm:$0xf] %v240_v3  ;;  %v252_v9 = vld [vmem:[%s817_s8 + $0x48] sm:$0xf]  ;;  %v254_v10 = vld [vmem:[%s817_s8 + $0x50] sm:$0xf] }
  0x16   : > { %243 = vst [vmem:[%s212_s9 + $0x10] sm:$0xf] %v242_v4  ;;  %v256_v11 = vld [vmem:[%s817_s8 + $0x58] sm:$0xf]  ;;  %v258_v12 = vld [vmem:[%s817_s8 + $0x60] sm:$0xf] }
  0x17   : > { %245 = vst [vmem:[%s212_s9 + $0x14] sm:$0xf] %v244_v5  ;;  %v260_v13 = vld [vmem:[%s817_s8 + $0x68] sm:$0xf]  ;;  %v262_v14 = vld [vmem:[%s817_s8 + $0x70] sm:$0xf] }
  0x18   : > { %247 = vst [vmem:[%s212_s9 + $0x18] sm:$0xf] %v246_v6  ;;  %v264_v15 = vld [vmem:[%s817_s8 + $0x78] sm:$0xf] }
  0x19   : > { %249 = vst [vmem:[%s212_s9 + $0x1c] sm:$0xf] %v248_v7 }
  0x1a   : > { %251 = vst [vmem:[%s212_s9 + $0x20] sm:$0xf] %v250_v8 }
  0x1b   : > { %253 = vst [vmem:[%s212_s9 + $0x24] sm:$0xf] %v252_v9 }
  0x1c   : > { %255 = vst [vmem:[%s212_s9 + $0x28] sm:$0xf] %v254_v10 }
  0x1d   : > { %257 = vst [vmem:[%s212_s9 + $0x2c] sm:$0xf] %v256_v11 }
  0x1e   : > { %259 = vst [vmem:[%s212_s9 + $0x30] sm:$0xf] %v258_v12 }
  0x1f   : > { %261 = vst [vmem:[%s212_s9 + $0x34] sm:$0xf] %v260_v13 }
  0x20   : > { %263 = vst [vmem:[%s212_s9 + $0x38] sm:$0xf] %v262_v14 }
  0x21   : > { %265 = vst [vmem:[%s212_s9 + $0x3c] sm:$0xf] %v264_v15 }
  0x22 PF: > { %p612_p6 = scmp.ge.s32.totalorder %s738_s24, 1  ;;  %p334_p7 = scmp.lt.s32.totalorder %s738_s24, 3 }
  0x24   : > { %p335_p8 = pnand %p612_p6, %p334_p7 }
  0x25   : > { %s341_s10 = sand.u32 (!%p335_p8), 1, %s722_s20   ;;  %p384_p9 = scmp.lt.s32.totalorder (!%p335_p8), %s730_s22, 1 }
  0x26   : > { %338 = sbr.rel (%p335_p8) target bundleno = 220 (0xdc), region = 77  ;;  %s613_s11 = sshll.u32 (!%p335_p8), %s341_s10, 6 }
  0x27   : > { %s343_s12 = scalar_lea.vmem (!%p335_p8), [#allocation4], %s613_s11  ;;  %s486_s15 = sld [smem:[#allocation3]] (!%p335_p8) }
  0x2b   : > { %v658_v16 = vld [vmem:[%s343_s12 + $0x38] sm:$0xff]  ;;  %v657_v17 = vld [vmem:[%s343_s12 + $0x30] sm:$0xff]  ;;  %v740_v18 = vmov 0.0   ;;  %v656_v19 = vld [vmem:[%s343_s12 + $0x28] sm:$0xff]  ;;  %s880_s22 = smov (!%p384_p9, %s730_s22), 1 }
  0x2c   : > { %468 = vmatpush.bf16.msra.mxu0 %v658_v16  ;;  %400 = vst [vmem:[#allocation2] sm:$0x3] %v740_v18  ;;  %v655_v20 = vld [vmem:[%s343_s12 + $0x20] sm:$0xff]  ;;  %v654_v21 = vld [vmem:[%s343_s12 + $0x18] sm:$0xff]  ;;  %v653_v22 = vld [vmem:[%s343_s12 + $0x10] sm:$0xff]  ;;  %s614_s16 = sshll.u32 %s880_s22, 1 }
  0x2d   : > { %v652_v23 = vld [vmem:[%s343_s12 + $0x8] sm:$0xff]  ;;  %v651_v24 = vld [vmem:[%s343_s12] sm:$0xff]  ;;  %v402_v25 = vld [vmem:[%s868_s1] sm:$0x3]  ;;  %s387_s19 = scalar_lea.vmem %s870_s3, %s614_s16  ;;  %v488_v30 = vstv %s486_s15  ;;  %s391_s26 = scalar_lea.vmem %s871_s4, %s614_s16 }
  0x2e   : > { %v403_v26 = vpack.c.bf16 %v402_v25, %v402_v25  ;;  %v490_v33 = vld [vmem:[%s387_s19] sm:$0x3]  ;;  %s395_s22 = scalar_lea.vmem %s872_s5, %s614_s16 }
  0x2f   : > { %v492_v35 = vld [vmem:[%s391_s26] sm:$0x3] }
  0x30   : > { %469 = vmatpush.bf16.msra.mxu0 %v657_v17 }
  0x33   : > { %v401_v27 = vld [vmem:[#allocation2] sm:$0x3] }
  0x34   : > { %470 = vmatpush.bf16.msra.mxu0 %v656_v19 }
  0x38   : > { %471 = vmatpush.bf16.msra.mxu0 %v655_v20 }
  0x3c   : > { %472 = vmatpush.bf16.msra.mxu0 %v654_v21 }
  0x40   : > { %473 = vmatpush.bf16.msra.mxu0 %v653_v22 }
  0x44   : > { %474 = vmatpush.bf16.msra.mxu0 %v652_v23 }
  0x48   : > { %475 = vmatpush.bf16.msra.mxu0 %v651_v24 }
  0x4b   : > { %476 = vmatmul.bf16.vlgmr.msra.gmra.mxu0 %v403_v26 }
  0xc8   : > { %v477_v28 = vpop.f32.mrf.mxu0 }
  0xc9   : > { %v481_v29 = vadd.f32 %v477_v28, %v401_v27 }
  0xcb   : > { %482 = vst [vmem:[#allocation2] sm:$0x3] %v481_v29 }
  0xd0   : > { %v479_v31 = vpop.f32.mrf.mxu0 }
  0xd2   : > { %v487_v32 = vld [vmem:[#allocation2] sm:$0x3] }
  0xd3   : > { %v489_v34 = vmul.f32 %v488_v30, %v487_v32 }
  0xd5   : > { %v491_v36 = vadd.f32 %v490_v33, %v489_v34 }
  0xd7   : > { %v493_v37 = vadd.f32 %v492_v35, %v491_v36 }
  0xd9   : > { %v494_v38 = vmax.f32 %v493_v37, 0.0 }
  0xdb   : > { %495 = vst [vmem:[%s395_s22] sm:$0x3] %v494_v38 }
  0xdc PF: > { %s16_s24 = sadd.s32 1, %s738_s24   ;;  %s873_s20 = smov %s726_s21 }
  0xdd   : > { %p13_p10 = scmp.ge.s32.totalorder %s16_s24, 4   ;;  %s874_s21 = smov %s809_s27 }
  0xde   : > { %s875_s22 = smov %s734_s23  ;;  %s876_s23 = smov %s878_s0 }
  0xdf   :  { %15 = sbr.rel (!%p13_p10) target bundleno = 5 (0x5), region = 133 }

// kernel: learn_fbp_forward.13
= control target key start
LH: loop header
LB: loop body
LE: loop exit
PB: predicated region body
PF: predicated region fallthrough
CT: control target
= control target key end

     0   :  { %s535_s12 = smov 0   ;;  %s537_s13 = smov 0   ;;  %s581_s0 = inlined_call_operand.vmem [shape: f32[2,256], index: 0, kind: input, shape index: {}]   ;;  %s582_s1 = inlined_call_operand.vmem [shape: bf16[256,128], index: 1, kind: input, shape index: {}]   ;;  %s583_s2 = inlined_call_operand.vmem [shape: f32[2,128], index: 2, kind: input, shape index: {}]   ;;  %s584_s3 = inlined_call_operand.vmem [shape: f32[2,128], index: 3, kind: output, shape index: {}]  }
   0x1   :  { %s539_s14 = smov 0  }
   0x2 LB: > { %s22_s15 = sadd.s32 1, %s508_s13  ;;  %p416_p0 = scmp.ge.s32.totalorder %s512_s14, 1  ;;  %s512_s14 = sphi %s539_s14, %s13_s14   ;;  %s508_s13 = sphi %s537_s13, %s586_s13   ;;  %s504_s12 = sphi %s535_s12, %s585_s12  }
   0x3   : > { %p23_p1 = scmp.ge.s32.totalorder %s22_s15, 2  ;;  %p173_p2 = scmp.lt.s32.totalorder %s512_s14, 3 }
   0x5   : > { %s588_s15 = smov (%p23_p1, %s22_s15), 0  ;;  %p174_p3 = pnand %p416_p0, %p173_p2 }
   0x6   : > { %p207_p4 = scmp.lt.s32.totalorder (!%p174_p3), %s504_s12, 1  ;;  %s418_s16 = sshll.u32 (!%p174_p3), %s504_s12, 4 }
   0x7   : > { %177 = sbr.rel (%p174_p3) target bundleno = 191 (0xbf), region = 32  ;;  %p212_p5 = scmp.lt.s32.totalorder (!%p174_p3), %s418_s16, 31 }
   0x8   : > { %p420_p6 = scmp.ne.s32.totalorder (!%p174_p3), %s504_s12, 0 }
   0xc   : > { %s208_s17 = scalar_select %p207_p4, %s504_s12, 1 }
   0xd   : > { %s590_s16 = smov (!%p212_p5, %s418_s16), 31  ;;  %231 = sbr.rel (%p420_p6) target bundleno = 20 (0x14), region = 36 }
   0xe   : > { %s417_s18 = sshll.u32 %s208_s17, 1  ;;  %s419_s22 = sshll.u32 %s590_s16, 2 }
   0xf   : > { %s210_s21 = scalar_lea.vmem %s581_s0, %s417_s18  ;;  %s218_s25 = scalar_lea.vmem %s582_s1, %s419_s22 }
  0x12   : > { %v514_v0 = vmov 0.0  }
  0x13   : > { %232 = vst [vmem:[#allocation2] sm:$0x3] %v514_v0 }
  0x14 PF: > { %v464_v1 = vld [vmem:[%s218_s25 + $0x38] sm:$0xff]  ;;  %v463_v2 = vld [vmem:[%s218_s25 + $0x30] sm:$0xff]  ;;  %v462_v3 = vld [vmem:[%s218_s25 + $0x28] sm:$0xff]  ;;  %p453_p7 = scmp.ne.s32.totalorder %s504_s12, 1 }
  0x15   : > { %300 = vmatpush.bf16.msra.mxu0 %v464_v1  ;;  %v461_v4 = vld [vmem:[%s218_s25 + $0x20] sm:$0xff]  ;;  %v460_v5 = vld [vmem:[%s218_s25 + $0x18] sm:$0xff]  ;;  %v459_v6 = vld [vmem:[%s218_s25 + $0x10] sm:$0xff] }
  0x16   : > { %v458_v7 = vld [vmem:[%s218_s25 + $0x8] sm:$0xff]  ;;  %v457_v8 = vld [vmem:[%s218_s25] sm:$0xff] }
  0x17   : > { %v234_v9 = vld [vmem:[%s210_s21] sm:$0x3] }
  0x18   : > { %v235_v10 = vpack.c.bf16 %v234_v9, %v234_v9 }
  0x19   : > { %301 = vmatpush.bf16.msra.mxu0 %v463_v2 }
  0x1a   : > { %v233_v11 = vld [vmem:[#allocation2] sm:$0x3] }
  0x1d   : > { %302 = vmatpush.bf16.msra.mxu0 %v462_v3 }
  0x21   : > { %303 = vmatpush.bf16.msra.mxu0 %v461_v4 }
  0x25   : > { %304 = vmatpush.bf16.msra.mxu0 %v460_v5 }
  0x29   : > { %305 = vmatpush.bf16.msra.mxu0 %v459_v6 }
  0x2d   : > { %306 = vmatpush.bf16.msra.mxu0 %v458_v7 }
  0x31   : > { %307 = vmatpush.bf16.msra.mxu0 %v457_v8 }
  0x34   : > { %308 = vmatmul.bf16.vlgmr.msra.gmra.mxu0 %v235_v10 }
  0xb1   : > { %v309_v12 = vpop.f32.mrf.mxu0 }
  0xb2   : > { %v313_v13 = vadd.f32 %v309_v12, %v233_v11 }
  0xb4   : > { %314 = vst [vmem:[#allocation2] sm:$0x3] %v313_v13 }
  0xb5   : > { %318 = sbr.rel (%p453_p7) target bundleno = 191 (0xbf), region = 40 }
  0xb9   : > { %v311_v14 = vpop.f32.mrf.mxu0 }
  0xba   : > { %v319_v15 = vld [vmem:[%s583_s2] sm:$0x3] }
  0xbb   : > { %v320_v16 = vld [vmem:[#allocation2] sm:$0x3] }
  0xbc   : > { %v321_v17 = vsub.f32 %v319_v15, %v320_v16 }
  0xbe   : > { %322 = vst [vmem:[%s584_s3] sm:$0x3] %v321_v17 }
  0xbf PF: > { %s13_s14 = sadd.s32 1, %s512_s14   ;;  %s585_s12 = smov %s508_s13 }
  0xc0   : > { %p10_p8 = scmp.ge.s32.totalorder %s13_s14, 4   ;;  %s586_s13 = smov %s588_s15 }
  0xc2   :  { %12 = sbr.rel (!%p10_p8) target bundleno = 2 (0x2), region = 76 }

</bundles_post_ra>
